<compile_context>
chip_gen: v5e
topology: v5e:2x2
jax: 0.10.0
libtpu: 0.0.40
codegen_flags: <defaults>
</compile_context>

<pallas_src>
import numpy as np

import jax
import jax.numpy as jnp
from jax.experimental import pallas as pl
from jax.experimental.pallas import tpu as pltpu


# ---------------------------------------------------------------------------
# Fused forward kernel (one batch tile per grid step, everything on the MXU)
# ---------------------------------------------------------------------------
def _lenet_kernel(xin_ref, w1_ref, b1_ref, w2_ref, b2_ref,
                  wf1_ref, bf1_ref, wf2_ref, bf2_ref, wf3_ref, bf3_ref,
                  o_ref):
    f32, bf16 = jnp.float32, jnp.bfloat16
    tb = o_ref.shape[0]                      # batch-tile size

    # ---- conv1 + ReLU + 2x2 maxpool (pool folded over 4 (ph, pw) phases) ----
    # xin_ref[ph] : [tb*12, 144]   row (b,u) -> input rows 2u+ph..2u+ph+4 flat
    # w1_ref[pw]  : [144, 128]     structured: lane v*6+c <- tap (i, j)
    # phase result row (b,u), lane v*6+c == conv1(b, c, 2u+ph, 2v+pw)
    acc = None
    for ph in range(2):
        lhs = xin_ref[ph]                                  # [tb*12, 144] bf16
        for pw in range(2):
            s = jnp.dot(lhs, w1_ref[pw], preferred_element_type=f32)
            acc = s if acc is None else jnp.maximum(acc, s)
    pool1 = jnp.maximum(acc + b1_ref[...], 0.0).astype(bf16)
    pool1 = pool1.reshape(tb, 12, 128)       # lanes: v*6+c (72 used, rest = 0)

    # ---- conv2 + ReLU: single K-packed structured matmul (K = 5*128) --------
    # lhs2[b, y2, i*128 + (v*6+c)] = pool1[b, y2+i, v, c]
    lhs2 = jnp.concatenate([pool1[:, i:i + 8, :] for i in range(5)], axis=-1)
    c2 = jnp.dot(lhs2.reshape(tb * 8, 640), w2_ref[...],
                 preferred_element_type=f32)
    c2 = jnp.maximum(c2 + b2_ref[...], 0.0).reshape(tb, 8, 128)  # lane = x2*16+o

    # ---- maxpool2 folded into a single structured fc1 matmul ---------------
    pieces = []
    for h in range(4):
        m = jnp.maximum(c2[:, 2 * h, :], c2[:, 2 * h + 1, :])       # pool over y2
        shifted = jnp.concatenate([m[:, 16:], m[:, :16]], axis=-1)  # lane-group +1 (x2+1)
        pieces.append(jnp.maximum(m, shifted))                      # pool over x2
    lhsf = jnp.concatenate(pieces, axis=-1).astype(bf16)            # [tb, 512]
    h1 = jnp.maximum(
        jnp.dot(lhsf, wf1_ref[...], preferred_element_type=f32) + bf1_ref[...],
        0.0)

    # ---- fc2 + ReLU, fc3 ----------------------------------------------------
    h2 = jnp.dot(h1.astype(bf16), wf2_ref[...], preferred_element_type=f32)
    h2 = jnp.maximum(h2 + bf2_ref[...], 0.0)
    logits = jnp.dot(h2.astype(bf16), wf3_ref[...], preferred_element_type=f32)
    o_ref[...] = logits + bf3_ref[...]                              # [tb, 128]


# ---------------------------------------------------------------------------
# Wrapper
# ---------------------------------------------------------------------------
def net_forward(kparams, x):
    """x: [B, 1, 28, 28] float32 (NCHW, like PyTorch) -> logits [B, 10]."""
    B = x.shape[0]
    xi = x.reshape(B, 28, 28).astype(jnp.float32)

    # LHS for the structured conv1 matmul: for each vertical pooling phase ph
    # and pooled output row u, flatten the 5 needed input rows (28 cols each).
    planes = []
    for ph in range(2):
        ridx = (ph + 2 * np.arange(12)[:, None] + np.arange(5)[None, :]).reshape(-1)
        planes.append(jnp.take(xi, jnp.asarray(ridx), axis=1).reshape(B, 12, 140))
    xin = jnp.stack(planes, axis=0)                        # [2, B, 12, 140]
    xin = jnp.pad(xin, ((0, 0), (0, 0), (0, 0), (0, 4)))   # pad K -> 144

    # Large batch tile for MXU occupancy; keep >=2 grid steps when possible
    # (v7x dual-TC) and batch-tile a multiple of 8 (sublane alignment).
    tb = 64 if B >= 128 else max(8, ((B + 1) // 2 + 7) // 8 * 8)
    Bp = ((B + tb - 1) // tb) * tb
    if Bp != B:
        xin = jnp.pad(xin, ((0, 0), (0, Bp - B), (0, 0), (0, 0)))
    xin = xin.astype(jnp.bfloat16).reshape(2, Bp * 12, 144)
    grid = (Bp // tb,)

    flops = int(Bp * (4 * 12 * 144 * 128 * 2      # conv1 (4 structured matmuls)
                      + 8 * 640 * 128 * 2         # conv2 (single K=640 matmul)
                      + 512 * 128 * 2             # fc1 (pool2 folded)
                      + 2 * 128 * 128 * 2))       # fc2 + fc3
    bytes_accessed = int(Bp * (2 * 12 * 144 * 2 + 128 * 4) + 450_000)

    out = pl.pallas_call(
        _lenet_kernel,
        out_shape=jax.ShapeDtypeStruct((Bp, 128), jnp.float32),
        grid_spec=pltpu.PrefetchScalarGridSpec(
            num_scalar_prefetch=0,
            grid=grid,
            in_specs=[
                pl.BlockSpec((2, tb * 12, 144), lambda b: (0, b, 0)),   # conv1 lhs
                pl.BlockSpec((2, 144, 128), lambda b: (0, 0, 0)),       # conv1 w
                pl.BlockSpec((1, 128), lambda b: (0, 0)),               # conv1 b
                pl.BlockSpec((640, 128), lambda b: (0, 0)),             # conv2 w
                pl.BlockSpec((1, 128), lambda b: (0, 0)),               # conv2 b
                pl.BlockSpec((512, 128), lambda b: (0, 0)),             # fc1 w
                pl.BlockSpec((1, 128), lambda b: (0, 0)),               # fc1 b
                pl.BlockSpec((128, 128), lambda b: (0, 0)),             # fc2 w
                pl.BlockSpec((1, 128), lambda b: (0, 0)),               # fc2 b
                pl.BlockSpec((128, 128), lambda b: (0, 0)),             # fc3 w
                pl.BlockSpec((1, 128), lambda b: (0, 0)),               # fc3 b
            ],
            out_specs=pl.BlockSpec((tb, 128), lambda b: (b, 0)),
        ),
        compiler_params=pltpu.CompilerParams(
            dimension_semantics=("parallel",),
            vmem_limit_bytes=32 * 1024 * 1024,
        ),
        cost_estimate=pl.CostEstimate(
            flops=flops, transcendentals=0, bytes_accessed=bytes_accessed),
    )(xin,
      kparams["w1"], kparams["b1"], kparams["w2"], kparams["b2"],
      kparams["wf1"], kparams["bf1"], kparams["wf2"], kparams["bf2"],
      kparams["wf3"], kparams["bf3"])

    return out[:B, :10]


# ---------------------------------------------------------------------------
# Parameters
# ---------------------------------------------------------------------------
def init_params(key):
    """PyTorch-shaped params with nn.Conv2d / nn.Linear default init."""
    def uniform(k, shape, fan_in):
        bound = 1.0 / jnp.sqrt(float(fan_in))
        return jax.random.uniform(k, shape, jnp.float32, -bound, bound)

    ks = jax.random.split(key, 10)
    return {
        "conv1_w": uniform(ks[0], (6, 1, 5, 5), 25),
        "conv1_b": uniform(ks[1], (6,), 25),
        "conv2_w": uniform(ks[2], (16, 6, 5, 5), 150),
        "conv2_b": uniform(ks[3], (16,), 150),
        "fc1_w": uniform(ks[4], (120, 256), 256),
        "fc1_b": uniform(ks[5], (120,), 256),
        "fc2_w": uniform(ks[6], (84, 120), 120),
        "fc2_b": uniform(ks[7], (84,), 120),
        "fc3_w": uniform(ks[8], (10, 84), 84),
        "fc3_b": uniform(ks[9], (10,), 84),
    }


def prepare_params(p):
    """One-time repack into structured, lane-dense MXU weights (bf16)."""
    f32 = np.float32
    cw1 = np.asarray(p["conv1_w"], f32)      # [6, 1, 5, 5]
    cb1 = np.asarray(p["conv1_b"], f32)      # [6]
    cw2 = np.asarray(p["conv2_w"], f32)      # [16, 6, 5, 5]
    cb2 = np.asarray(p["conv2_b"], f32)      # [16]
    fw1 = np.asarray(p["fc1_w"], f32)        # [120, 256]
    fb1 = np.asarray(p["fc1_b"], f32)
    fw2 = np.asarray(p["fc2_w"], f32)        # [84, 120]
    fb2 = np.asarray(p["fc2_b"], f32)
    fw3 = np.asarray(p["fc3_w"], f32)        # [10, 84]
    fb3 = np.asarray(p["fc3_b"], f32)

    # conv1: two structured matrices (one per horizontal pooling phase pw).
    #   row = i*28 + col (flattened 5 input rows), lane = v*6 + c,
    #   value = conv1_w[c,0,i,j] with j = col - (2v + pw).
    w1r = np.zeros((2, 144, 128), f32)
    for pw in range(2):
        for i in range(5):
            for j in range(5):
                for v in range(12):
                    w1r[pw, i * 28 + 2 * v + pw + j, v * 6:v * 6 + 6] = cw1[:, 0, i, j]
    b1r = np.zeros((1, 128), f32)
    b1r[0, :72] = np.tile(cb1, 12)

    # conv2: rows = i*128 + v*6 + c (pool1 rows y2..y2+4 concatenated in lanes),
    #        cols = x2*16 + o, value = conv2_w[o,c,i,j] with j = v - x2.
    w2r = np.zeros((640, 128), f32)
    for i in range(5):
        for j in range(5):
            for x2 in range(8):
                v = x2 + j
                w2r[i * 128 + v * 6:i * 128 + v * 6 + 6,
                    x2 * 16:x2 * 16 + 16] = cw2[:, :, i, j].T
    b2r = np.zeros((1, 128), f32)
    b2r[0, :] = np.tile(cb2, 8)

    # fc1 with maxpool2 folded in: rows = h*128 + 32*w + o (lane layout of the
    # pooled conv2 activations), cols = output feature (120 of 128).
    wf1r = np.zeros((512, 128), f32)
    for o in range(16):
        for h in range(4):
            for w in range(4):
                wf1r[h * 128 + 32 * w + o, :120] = fw1[:, o * 16 + h * 4 + w]
    bf1r = np.zeros((1, 128), f32); bf1r[0, :120] = fb1

    wf2r = np.zeros((128, 128), f32); wf2r[:120, :84] = fw2.T
    bf2r = np.zeros((1, 128), f32); bf2r[0, :84] = fb2
    wf3r = np.zeros((128, 128), f32); wf3r[:84, :10] = fw3.T
    bf3r = np.zeros((1, 128), f32); bf3r[0, :10] = fb3

    asbf = lambda a: jnp.asarray(a).astype(jnp.bfloat16)
    return {"w1": asbf(w1r), "b1": jnp.asarray(b1r),
            "w2": asbf(w2r), "b2": jnp.asarray(b2r),
            "wf1": asbf(wf1r), "bf1": jnp.asarray(bf1r),
            "wf2": asbf(wf2r), "bf2": jnp.asarray(bf2r),
            "wf3": asbf(wf3r), "bf3": jnp.asarray(bf3r)}


# ---------------------------------------------------------------------------
# Pure-JAX reference (matches the PyTorch module in f32)
# ---------------------------------------------------------------------------
def net_reference(p, x):
    def conv(x, w, b):
        y = jax.lax.conv_general_dilated(
            x, w, (1, 1), "VALID", dimension_numbers=("NCHW", "OIHW", "NCHW"))
        return y + b[None, :, None, None]

    def pool(x):
        return jax.lax.reduce_window(
            x, -jnp.inf, jax.lax.max, (1, 1, 2, 2), (1, 1, 2, 2), "VALID")

    x = pool(jax.nn.relu(conv(x, p["conv1_w"], p["conv1_b"])))
    x = pool(jax.nn.relu(conv(x, p["conv2_w"], p["conv2_b"])))
    x = x.reshape(x.shape[0], -1)
    x = jax.nn.relu(x @ p["fc1_w"].T + p["fc1_b"])
    x = jax.nn.relu(x @ p["fc2_w"].T + p["fc2_b"])
    return x @ p["fc3_w"].T + p["fc3_b"]


if __name__ == "__main__":
    key = jax.random.PRNGKey(0)
    pkey, xkey = jax.random.split(key)
    params = init_params(pkey)
    kparams = prepare_params(params)
    # Input implied by the module: 1x28x28 images (16*4*4 after two conv5+pool2).
    x = jax.random.normal(xkey, (2, 1, 28, 28), dtype=jnp.float32)

    fwd = jax.jit(net_forward)
    out = jax.block_until_ready(fwd(kparams, x))
    assert out.shape == (2, 10) and out.dtype == jnp.float32

    ref = net_reference(params, x)
    np.testing.assert_allclose(np.asarray(out), np.asarray(ref),
                               rtol=5e-2, atol=5e-2)
    print("KERNEL_OK")
</pallas_src>

<mosaic_0001>
module attributes {stable_mosaic.version = 11 : i64} {
  func.func @_lenet_kernel(%arg0: i32, %arg1: memref<2x96x144xbf16, #tpu.memory_space<vmem>>, %arg2: memref<2x144x128xbf16, #tpu.memory_space<vmem>>, %arg3: memref<1x128xf32, #tpu.memory_space<vmem>>, %arg4: memref<640x128xbf16, #tpu.memory_space<vmem>>, %arg5: memref<1x128xf32, #tpu.memory_space<vmem>>, %arg6: memref<512x128xbf16, #tpu.memory_space<vmem>>, %arg7: memref<1x128xf32, #tpu.memory_space<vmem>>, %arg8: memref<128x128xbf16, #tpu.memory_space<vmem>>, %arg9: memref<1x128xf32, #tpu.memory_space<vmem>>, %arg10: memref<128x128xbf16, #tpu.memory_space<vmem>>, %arg11: memref<1x128xf32, #tpu.memory_space<vmem>>, %arg12: memref<8x128xf32, #tpu.memory_space<vmem>>) attributes {dimension_semantics = [#tpu.dimension_semantics<parallel>], iteration_bounds = array<i64: 1>, scalar_prefetch = 0 : i64, scratch_operands = 0 : i64, tpu.core_type = #tpu.core_type<tc>, window_params = [{transform_indices = @transform_0, window_bounds = array<i64: 2, 96, 144>}, {pipeline_mode = #tpu.pipeline_mode<synchronous>, transform_indices = @transform_1, window_bounds = array<i64: 2, 144, 128>}, {pipeline_mode = #tpu.pipeline_mode<synchronous>, transform_indices = @transform_2, window_bounds = array<i64: 1, 128>}, {pipeline_mode = #tpu.pipeline_mode<synchronous>, transform_indices = @transform_3, window_bounds = array<i64: 640, 128>}, {pipeline_mode = #tpu.pipeline_mode<synchronous>, transform_indices = @transform_4, window_bounds = array<i64: 1, 128>}, {pipeline_mode = #tpu.pipeline_mode<synchronous>, transform_indices = @transform_5, window_bounds = array<i64: 512, 128>}, {pipeline_mode = #tpu.pipeline_mode<synchronous>, transform_indices = @transform_6, window_bounds = array<i64: 1, 128>}, {pipeline_mode = #tpu.pipeline_mode<synchronous>, transform_indices = @transform_7, window_bounds = array<i64: 128, 128>}, {pipeline_mode = #tpu.pipeline_mode<synchronous>, transform_indices = @transform_8, window_bounds = array<i64: 1, 128>}, {pipeline_mode = #tpu.pipeline_mode<synchronous>, transform_indices = @transform_9, window_bounds = array<i64: 128, 128>}, {pipeline_mode = #tpu.pipeline_mode<synchronous>, transform_indices = @transform_10, window_bounds = array<i64: 1, 128>}, {transform_indices = @transform_11, window_bounds = array<i64: 8, 128>}]} {
    %c0 = arith.constant 0 : index
    %c0_0 = arith.constant 0 : index
    %c0_1 = arith.constant 0 : index
    %0 = vector.load %arg1[%c0, %c0_0, %c0_1] : memref<2x96x144xbf16, #tpu.memory_space<vmem>>, vector<1x96x144xbf16>
    %1 = vector.shape_cast %0 : vector<1x96x144xbf16> to vector<96x144xbf16>
    %c0_2 = arith.constant 0 : index
    %c0_3 = arith.constant 0 : index
    %c0_4 = arith.constant 0 : index
    %2 = vector.load %arg2[%c0_2, %c0_3, %c0_4] : memref<2x144x128xbf16, #tpu.memory_space<vmem>>, vector<1x144x128xbf16>
    %3 = vector.shape_cast %2 : vector<1x144x128xbf16> to vector<144x128xbf16>
    %cst = arith.constant dense<0.000000e+00> : vector<96x128xf32>
    %4 = tpu.matmul %1, %3, %cst {dimension_numbers = #tpu.dot_dimension_numbers<[1], [0], [0], [1], [0, 0, 1, 1], [], []>} : vector<96x144xbf16>, vector<144x128xbf16>, vector<96x128xf32> -> vector<96x128xf32>
    %c1 = arith.constant 1 : index
    %c0_5 = arith.constant 0 : index
    %c0_6 = arith.constant 0 : index
    %5 = vector.load %arg2[%c1, %c0_5, %c0_6] : memref<2x144x128xbf16, #tpu.memory_space<vmem>>, vector<1x144x128xbf16>
    %6 = vector.shape_cast %5 : vector<1x144x128xbf16> to vector<144x128xbf16>
    %cst_7 = arith.constant dense<0.000000e+00> : vector<96x128xf32>
    %7 = tpu.matmul %1, %6, %cst_7 {dimension_numbers = #tpu.dot_dimension_numbers<[1], [0], [0], [1], [0, 0, 1, 1], [], []>} : vector<96x144xbf16>, vector<144x128xbf16>, vector<96x128xf32> -> vector<96x128xf32>
    %8 = arith.maximumf %4, %7 : vector<96x128xf32>
    %c1_8 = arith.constant 1 : index
    %c0_9 = arith.constant 0 : index
    %c0_10 = arith.constant 0 : index
    %9 = vector.load %arg1[%c1_8, %c0_9, %c0_10] : memref<2x96x144xbf16, #tpu.memory_space<vmem>>, vector<1x96x144xbf16>
    %10 = vector.shape_cast %9 : vector<1x96x144xbf16> to vector<96x144xbf16>
    %c0_11 = arith.constant 0 : index
    %c0_12 = arith.constant 0 : index
    %c0_13 = arith.constant 0 : index
    %11 = vector.load %arg2[%c0_11, %c0_12, %c0_13] : memref<2x144x128xbf16, #tpu.memory_space<vmem>>, vector<1x144x128xbf16>
    %12 = vector.shape_cast %11 : vector<1x144x128xbf16> to vector<144x128xbf16>
    %cst_14 = arith.constant dense<0.000000e+00> : vector<96x128xf32>
    %13 = tpu.matmul %10, %12, %cst_14 {dimension_numbers = #tpu.dot_dimension_numbers<[1], [0], [0], [1], [0, 0, 1, 1], [], []>} : vector<96x144xbf16>, vector<144x128xbf16>, vector<96x128xf32> -> vector<96x128xf32>
    %14 = arith.maximumf %8, %13 : vector<96x128xf32>
    %c1_15 = arith.constant 1 : index
    %c0_16 = arith.constant 0 : index
    %c0_17 = arith.constant 0 : index
    %15 = vector.load %arg2[%c1_15, %c0_16, %c0_17] : memref<2x144x128xbf16, #tpu.memory_space<vmem>>, vector<1x144x128xbf16>
    %16 = vector.shape_cast %15 : vector<1x144x128xbf16> to vector<144x128xbf16>
    %cst_18 = arith.constant dense<0.000000e+00> : vector<96x128xf32>
    %17 = tpu.matmul %10, %16, %cst_18 {dimension_numbers = #tpu.dot_dimension_numbers<[1], [0], [0], [1], [0, 0, 1, 1], [], []>} : vector<96x144xbf16>, vector<144x128xbf16>, vector<96x128xf32> -> vector<96x128xf32>
    %18 = arith.maximumf %14, %17 : vector<96x128xf32>
    %c0_19 = arith.constant 0 : index
    %c0_20 = arith.constant 0 : index
    %19 = vector.load %arg3[%c0_19, %c0_20] : memref<1x128xf32, #tpu.memory_space<vmem>>, vector<1x128xf32>
    %20 = vector.broadcast %19 : vector<1x128xf32> to vector<96x128xf32>
    %21 = arith.addf %18, %20 : vector<96x128xf32>
    %cst_21 = arith.constant 0.000000e+00 : f32
    %22 = vector.broadcast %cst_21 : f32 to vector<96x128xf32>
    %23 = arith.maximumf %21, %22 : vector<96x128xf32>
    %24 = arith.truncf %23 : vector<96x128xf32> to vector<96x128xbf16>
    %25 = vector.shape_cast %24 : vector<96x128xbf16> to vector<8x12x128xbf16>
    %26 = vector.extract_strided_slice %25 {offsets = [0, 0, 0], sizes = [8, 8, 128], strides = [1, 1, 1]} : vector<8x12x128xbf16> to vector<8x8x128xbf16>
    %27 = vector.extract_strided_slice %25 {offsets = [0, 1, 0], sizes = [8, 8, 128], strides = [1, 1, 1]} : vector<8x12x128xbf16> to vector<8x8x128xbf16>
    %28 = vector.extract_strided_slice %25 {offsets = [0, 2, 0], sizes = [8, 8, 128], strides = [1, 1, 1]} : vector<8x12x128xbf16> to vector<8x8x128xbf16>
    %29 = vector.extract_strided_slice %25 {offsets = [0, 3, 0], sizes = [8, 8, 128], strides = [1, 1, 1]} : vector<8x12x128xbf16> to vector<8x8x128xbf16>
    %30 = vector.extract_strided_slice %25 {offsets = [0, 4, 0], sizes = [8, 8, 128], strides = [1, 1, 1]} : vector<8x12x128xbf16> to vector<8x8x128xbf16>
    %31 = tpu.concatenate %26, %27, %28, %29, %30 in 2 : vector<8x8x128xbf16>, vector<8x8x128xbf16>, vector<8x8x128xbf16>, vector<8x8x128xbf16>, vector<8x8x128xbf16> -> vector<8x8x640xbf16>
    %32 = vector.shape_cast %31 : vector<8x8x640xbf16> to vector<64x640xbf16>
    %c0_22 = arith.constant 0 : index
    %c0_23 = arith.constant 0 : index
    %33 = vector.load %arg4[%c0_22, %c0_23] : memref<640x128xbf16, #tpu.memory_space<vmem>>, vector<640x128xbf16>
    %cst_24 = arith.constant dense<0.000000e+00> : vector<64x128xf32>
    %34 = tpu.matmul %32, %33, %cst_24 {dimension_numbers = #tpu.dot_dimension_numbers<[1], [0], [0], [1], [0, 0, 1, 1], [], []>} : vector<64x640xbf16>, vector<640x128xbf16>, vector<64x128xf32> -> vector<64x128xf32>
    %c0_25 = arith.constant 0 : index
    %c0_26 = arith.constant 0 : index
    %35 = vector.load %arg5[%c0_25, %c0_26] : memref<1x128xf32, #tpu.memory_space<vmem>>, vector<1x128xf32>
    %36 = vector.broadcast %35 : vector<1x128xf32> to vector<64x128xf32>
    %37 = arith.addf %34, %36 : vector<64x128xf32>
    %cst_27 = arith.constant 0.000000e+00 : f32
    %38 = vector.broadcast %cst_27 : f32 to vector<64x128xf32>
    %39 = arith.maximumf %37, %38 : vector<64x128xf32>
    %40 = vector.shape_cast %39 : vector<64x128xf32> to vector<8x8x128xf32>
    %41 = vector.extract_strided_slice %40 {offsets = [0, 0, 0], sizes = [8, 1, 128], strides = [1, 1, 1]} : vector<8x8x128xf32> to vector<8x1x128xf32>
    %42 = vector.shape_cast %41 : vector<8x1x128xf32> to vector<8x128xf32>
    %43 = vector.extract_strided_slice %40 {offsets = [0, 1, 0], sizes = [8, 1, 128], strides = [1, 1, 1]} : vector<8x8x128xf32> to vector<8x1x128xf32>
    %44 = vector.shape_cast %43 : vector<8x1x128xf32> to vector<8x128xf32>
    %45 = arith.maximumf %42, %44 : vector<8x128xf32>
    %46 = vector.extract_strided_slice %45 {offsets = [0, 16], sizes = [8, 112], strides = [1, 1]} : vector<8x128xf32> to vector<8x112xf32>
    %47 = vector.extract_strided_slice %45 {offsets = [0, 0], sizes = [8, 16], strides = [1, 1]} : vector<8x128xf32> to vector<8x16xf32>
    %48 = tpu.concatenate %46, %47 in 1 : vector<8x112xf32>, vector<8x16xf32> -> vector<8x128xf32>
    %49 = arith.maximumf %45, %48 : vector<8x128xf32>
    %50 = vector.extract_strided_slice %40 {offsets = [0, 2, 0], sizes = [8, 1, 128], strides = [1, 1, 1]} : vector<8x8x128xf32> to vector<8x1x128xf32>
    %51 = vector.shape_cast %50 : vector<8x1x128xf32> to vector<8x128xf32>
    %52 = vector.extract_strided_slice %40 {offsets = [0, 3, 0], sizes = [8, 1, 128], strides = [1, 1, 1]} : vector<8x8x128xf32> to vector<8x1x128xf32>
    %53 = vector.shape_cast %52 : vector<8x1x128xf32> to vector<8x128xf32>
    %54 = arith.maximumf %51, %53 : vector<8x128xf32>
    %55 = vector.extract_strided_slice %54 {offsets = [0, 16], sizes = [8, 112], strides = [1, 1]} : vector<8x128xf32> to vector<8x112xf32>
    %56 = vector.extract_strided_slice %54 {offsets = [0, 0], sizes = [8, 16], strides = [1, 1]} : vector<8x128xf32> to vector<8x16xf32>
    %57 = tpu.concatenate %55, %56 in 1 : vector<8x112xf32>, vector<8x16xf32> -> vector<8x128xf32>
    %58 = arith.maximumf %54, %57 : vector<8x128xf32>
    %59 = vector.extract_strided_slice %40 {offsets = [0, 4, 0], sizes = [8, 1, 128], strides = [1, 1, 1]} : vector<8x8x128xf32> to vector<8x1x128xf32>
    %60 = vector.shape_cast %59 : vector<8x1x128xf32> to vector<8x128xf32>
    %61 = vector.extract_strided_slice %40 {offsets = [0, 5, 0], sizes = [8, 1, 128], strides = [1, 1, 1]} : vector<8x8x128xf32> to vector<8x1x128xf32>
    %62 = vector.shape_cast %61 : vector<8x1x128xf32> to vector<8x128xf32>
    %63 = arith.maximumf %60, %62 : vector<8x128xf32>
    %64 = vector.extract_strided_slice %63 {offsets = [0, 16], sizes = [8, 112], strides = [1, 1]} : vector<8x128xf32> to vector<8x112xf32>
    %65 = vector.extract_strided_slice %63 {offsets = [0, 0], sizes = [8, 16], strides = [1, 1]} : vector<8x128xf32> to vector<8x16xf32>
    %66 = tpu.concatenate %64, %65 in 1 : vector<8x112xf32>, vector<8x16xf32> -> vector<8x128xf32>
    %67 = arith.maximumf %63, %66 : vector<8x128xf32>
    %68 = vector.extract_strided_slice %40 {offsets = [0, 6, 0], sizes = [8, 1, 128], strides = [1, 1, 1]} : vector<8x8x128xf32> to vector<8x1x128xf32>
    %69 = vector.shape_cast %68 : vector<8x1x128xf32> to vector<8x128xf32>
    %70 = vector.extract_strided_slice %40 {offsets = [0, 7, 0], sizes = [8, 1, 128], strides = [1, 1, 1]} : vector<8x8x128xf32> to vector<8x1x128xf32>
    %71 = vector.shape_cast %70 : vector<8x1x128xf32> to vector<8x128xf32>
    %72 = arith.maximumf %69, %71 : vector<8x128xf32>
    %73 = vector.extract_strided_slice %72 {offsets = [0, 16], sizes = [8, 112], strides = [1, 1]} : vector<8x128xf32> to vector<8x112xf32>
    %74 = vector.extract_strided_slice %72 {offsets = [0, 0], sizes = [8, 16], strides = [1, 1]} : vector<8x128xf32> to vector<8x16xf32>
    %75 = tpu.concatenate %73, %74 in 1 : vector<8x112xf32>, vector<8x16xf32> -> vector<8x128xf32>
    %76 = arith.maximumf %72, %75 : vector<8x128xf32>
    %77 = tpu.concatenate %49, %58, %67, %76 in 1 : vector<8x128xf32>, vector<8x128xf32>, vector<8x128xf32>, vector<8x128xf32> -> vector<8x512xf32>
    %78 = arith.truncf %77 : vector<8x512xf32> to vector<8x512xbf16>
    %c0_28 = arith.constant 0 : index
    %c0_29 = arith.constant 0 : index
    %79 = vector.load %arg6[%c0_28, %c0_29] : memref<512x128xbf16, #tpu.memory_space<vmem>>, vector<512x128xbf16>
    %cst_30 = arith.constant dense<0.000000e+00> : vector<8x128xf32>
    %80 = tpu.matmul %78, %79, %cst_30 {dimension_numbers = #tpu.dot_dimension_numbers<[1], [0], [0], [1], [0, 0, 1, 1], [], []>} : vector<8x512xbf16>, vector<512x128xbf16>, vector<8x128xf32> -> vector<8x128xf32>
    %c0_31 = arith.constant 0 : index
    %c0_32 = arith.constant 0 : index
    %81 = vector.load %arg7[%c0_31, %c0_32] : memref<1x128xf32, #tpu.memory_space<vmem>>, vector<1x128xf32>
    %82 = vector.broadcast %81 : vector<1x128xf32> to vector<8x128xf32>
    %83 = arith.addf %80, %82 : vector<8x128xf32>
    %cst_33 = arith.constant 0.000000e+00 : f32
    %84 = vector.broadcast %cst_33 : f32 to vector<8x128xf32>
    %85 = arith.maximumf %83, %84 : vector<8x128xf32>
    %86 = arith.truncf %85 : vector<8x128xf32> to vector<8x128xbf16>
    %c0_34 = arith.constant 0 : index
    %c0_35 = arith.constant 0 : index
    %87 = vector.load %arg8[%c0_34, %c0_35] : memref<128x128xbf16, #tpu.memory_space<vmem>>, vector<128x128xbf16>
    %cst_36 = arith.constant dense<0.000000e+00> : vector<8x128xf32>
    %88 = tpu.matmul %86, %87, %cst_36 {dimension_numbers = #tpu.dot_dimension_numbers<[1], [0], [0], [1], [0, 0, 1, 1], [], []>} : vector<8x128xbf16>, vector<128x128xbf16>, vector<8x128xf32> -> vector<8x128xf32>
    %c0_37 = arith.constant 0 : index
    %c0_38 = arith.constant 0 : index
    %89 = vector.load %arg9[%c0_37, %c0_38] : memref<1x128xf32, #tpu.memory_space<vmem>>, vector<1x128xf32>
    %90 = vector.broadcast %89 : vector<1x128xf32> to vector<8x128xf32>
    %91 = arith.addf %88, %90 : vector<8x128xf32>
    %cst_39 = arith.constant 0.000000e+00 : f32
    %92 = vector.broadcast %cst_39 : f32 to vector<8x128xf32>
    %93 = arith.maximumf %91, %92 : vector<8x128xf32>
    %94 = arith.truncf %93 : vector<8x128xf32> to vector<8x128xbf16>
    %c0_40 = arith.constant 0 : index
    %c0_41 = arith.constant 0 : index
    %95 = vector.load %arg10[%c0_40, %c0_41] : memref<128x128xbf16, #tpu.memory_space<vmem>>, vector<128x128xbf16>
    %cst_42 = arith.constant dense<0.000000e+00> : vector<8x128xf32>
    %96 = tpu.matmul %94, %95, %cst_42 {dimension_numbers = #tpu.dot_dimension_numbers<[1], [0], [0], [1], [0, 0, 1, 1], [], []>} : vector<8x128xbf16>, vector<128x128xbf16>, vector<8x128xf32> -> vector<8x128xf32>
    %c0_43 = arith.constant 0 : index
    %c0_44 = arith.constant 0 : index
    %97 = vector.load %arg11[%c0_43, %c0_44] : memref<1x128xf32, #tpu.memory_space<vmem>>, vector<1x128xf32>
    %98 = vector.broadcast %97 : vector<1x128xf32> to vector<8x128xf32>
    %99 = arith.addf %96, %98 : vector<8x128xf32>
    %c0_45 = arith.constant 0 : index
    %c0_46 = arith.constant 0 : index
    %100 = vector.load %arg12[%c0_45, %c0_46] : memref<8x128xf32, #tpu.memory_space<vmem>>, vector<8x128xf32>
    tpu.vector_store %arg12[%c0_45, %c0_46], %99 {strides = array<i32>} : memref<8x128xf32, #tpu.memory_space<vmem>>, vector<8x128xf32>,
    return
  }
  func.func @transform_0(%arg0: i32) -> (i32, i32, i32) {
    %c0_i32 = arith.constant 0 : i32
    %c0_i32_0 = arith.constant 0 : i32
    %c0_i32_1 = arith.constant 0 : i32
    return %c0_i32, %arg0, %c0_i32_0 : i32, i32, i32
  }
  func.func @transform_1(%arg0: i32) -> (i32, i32, i32) {
    %c0_i32 = arith.constant 0 : i32
    %c0_i32_0 = arith.constant 0 : i32
    %c0_i32_1 = arith.constant 0 : i32
    %c0_i32_2 = arith.constant 0 : i32
    return %c0_i32, %c0_i32_0, %c0_i32_1 : i32, i32, i32
  }
  func.func @transform_2(%arg0: i32) -> (i32, i32) {
    %c0_i32 = arith.constant 0 : i32
    %c0_i32_0 = arith.constant 0 : i32
    %c0_i32_1 = arith.constant 0 : i32
    return %c0_i32, %c0_i32_0 : i32, i32
  }
  func.func @transform_3(%arg0: i32) -> (i32, i32) {
    %c0_i32 = arith.constant 0 : i32
    %c0_i32_0 = arith.constant 0 : i32
    %c0_i32_1 = arith.constant 0 : i32
    return %c0_i32, %c0_i32_0 : i32, i32
  }
  func.func @transform_4(%arg0: i32) -> (i32, i32) {
    %c0_i32 = arith.constant 0 : i32
    %c0_i32_0 = arith.constant 0 : i32
    %c0_i32_1 = arith.constant 0 : i32
    return %c0_i32, %c0_i32_0 : i32, i32
  }
  func.func @transform_5(%arg0: i32) -> (i32, i32) {
    %c0_i32 = arith.constant 0 : i32
    %c0_i32_0 = arith.constant 0 : i32
    %c0_i32_1 = arith.constant 0 : i32
    return %c0_i32, %c0_i32_0 : i32, i32
  }
  func.func @transform_6(%arg0: i32) -> (i32, i32) {
    %c0_i32 = arith.constant 0 : i32
    %c0_i32_0 = arith.constant 0 : i32
    %c0_i32_1 = arith.constant 0 : i32
    return %c0_i32, %c0_i32_0 : i32, i32
  }
  func.func @transform_7(%arg0: i32) -> (i32, i32) {
    %c0_i32 = arith.constant 0 : i32
    %c0_i32_0 = arith.constant 0 : i32
    %c0_i32_1 = arith.constant 0 : i32
    return %c0_i32, %c0_i32_0 : i32, i32
  }
  func.func @transform_8(%arg0: i32) -> (i32, i32) {
    %c0_i32 = arith.constant 0 : i32
    %c0_i32_0 = arith.constant 0 : i32
    %c0_i32_1 = arith.constant 0 : i32
    return %c0_i32, %c0_i32_0 : i32, i32
  }
  func.func @transform_9(%arg0: i32) -> (i32, i32) {
    %c0_i32 = arith.constant 0 : i32
    %c0_i32_0 = arith.constant 0 : i32
    %c0_i32_1 = arith.constant 0 : i32
    return %c0_i32, %c0_i32_0 : i32, i32
  }
  func.func @transform_10(%arg0: i32) -> (i32, i32) {
    %c0_i32 = arith.constant 0 : i32
    %c0_i32_0 = arith.constant 0 : i32
    %c0_i32_1 = arith.constant 0 : i32
    return %c0_i32, %c0_i32_0 : i32, i32
  }
  func.func @transform_11(%arg0: i32) -> (i32, i32) {
    %c0_i32 = arith.constant 0 : i32
    %c0_i32_0 = arith.constant 0 : i32
    return %arg0, %c0_i32 : i32, i32
  }
}

</mosaic_0001>

<bundles_post_ra>
// kernel: net_forward.1
= control target key start
LH: loop header
LB: loop body
LE: loop exit
PB: predicated region body
PF: predicated region fallthrough
CT: control target
= control target key end

     0   :  { %vm177_vm0 = vcmask 130048   ;;  %vm766_vm1 = vcmask 1041408   ;;  %vm770_vm2 = vcmask 1043458   ;;  %vm1751_vm3 = vcmask 1041409   ;;  %s3208_s18 = smov 112   ;;  %s4333_s1 = inlined_call_operand.vmem [shape: bf16[2,144,128], index: 1, kind: input, shape index: {}]   ;;  %s4334_s0 = inlined_call_operand.vmem [shape: bf16[2,96,144], index: 0, kind: input, shape index: {}]   ;;  %s4335_s2 = inlined_call_operand.vmem [shape: f32[1,128], index: 2, kind: input, shape index: {}]   ;;  %s4336_s3 = inlined_call_operand.vmem [shape: bf16[640,128], index: 3, kind: input, shape index: {}]   ;;  %s4337_s4 = inlined_call_operand.vmem [shape: f32[1,128], index: 4, kind: input, shape index: {}]   ;;  %s4338_s5 = inlined_call_operand.vmem [shape: bf16[512,128], index: 5, kind: input, shape index: {}]   ;;  %s4339_s7 = inlined_call_operand.vmem [shape: bf16[128,128], index: 7, kind: input, shape index: {}]   ;;  %s4340_s6 = inlined_call_operand.vmem [shape: f32[1,128], index: 6, kind: input, shape index: {}]   ;;  %s4341_s8 = inlined_call_operand.vmem [shape: f32[1,128], index: 8, kind: input, shape index: {}]   ;;  %s4342_s9 = inlined_call_operand.vmem [shape: bf16[128,128], index: 9, kind: input, shape index: {}]   ;;  %s4343_s10 = inlined_call_operand.vmem [shape: f32[1,128], index: 10, kind: input, shape index: {}]   ;;  %s4344_s11 = inlined_call_operand.vmem [shape: f32[8,128], index: 11, kind: output, shape index: {}]  }
   0x1   :  { %v3081_v0 = vld [vmem:[%s4333_s1 + $0x38] sm:$0xff]  ;;  %v3090_v1 = vld [vmem:[%s4333_s1 + $0x80] sm:$0xff]  ;;  %v3091_v2 = vld [vmem:[%s4333_s1 + $0x88] sm:$0xff]  ;;  %vm1754_vm4 = vcmask 1042434   ;;  %vm1757_vm5 = vcmask 1043459   ;;  %vm1760_vm6 = vcmask 1044484  }
   0x2   :  { %v3062_v3 = vld [vmem:[%s4334_s0 + $0x4] sm:$0xf]  ;;  %v2492_v4 = vld [vmem:[%s4334_s0 + $0x8] sm:$0xf0]  ;;  %196 = vmatpush.bf16.msra.mxu0 %v3081_v0  ;;  %347 = vmatpush.bf16.msra.mxu2 %v3090_v1  ;;  %v3080_v6 = vld [vmem:[%s4333_s1 + $0x30] sm:$0xff]  ;;  %vm1763_vm7 = vcmask 1045509  }
   0x3   :  { %v2495_v5 = vor.u32 %v3062_v3, %v2492_v4  ;;  %v3082_v7 = vld [vmem:[%s4333_s1 + $0x40] sm:$0xff]  ;;  %393 = vmatpush.bf16.msra.mxu3 %v3091_v2  ;;  %v3089_v8 = vld [vmem:[%s4333_s1 + $0x78] sm:$0xff]  ;;  %v3079_v9 = vld [vmem:[%s4333_s1 + $0x28] sm:$0xff]  ;;  %vm1766_vm8 = vcmask 1046534   ;;  %vm1769_vm9 = vcmask 1047559  }
   0x4   :  { %242 = vmatpush.bf16.msra.mxu1 %v3082_v7  ;;  %v3088_v10 = vld [vmem:[%s4333_s1 + $0x70] sm:$0xff]  ;;  %v3078_v11 = vld [vmem:[%s4333_s1 + $0x20] sm:$0xff]  ;;  %v3087_v12 = vld [vmem:[%s4333_s1 + $0x68] sm:$0xff] }
   0x5   :  { %v3077_v13 = vld [vmem:[%s4333_s1 + $0x18] sm:$0xff]  ;;  %v3086_v14 = vld [vmem:[%s4333_s1 + $0x60] sm:$0xff]  ;;  %v3064_v15 = vld [vmem:[%s4334_s0 + $0x14] sm:$0xf] }
   0x6   :  { %2632 = vmatmul.msk.bf16.vlgmr.msra.gmra.mxu3 %vm177_vm0, %v2495_v5  ;;  %197 = vmatpush.bf16.msra.mxu0 %v3080_v6  ;;  %v2500_v16 = vld [vmem:[%s4334_s0 + $0x18] sm:$0xf0]  ;;  %v3076_v18 = vld [vmem:[%s4333_s1 + $0x10] sm:$0xff]  ;;  %v3075_v20 = vld [vmem:[%s4333_s1 + $0x8] sm:$0xff] }
   0x7   :  { %568 = vmatpush.bf16.msrb.mxu3 %v3082_v7  ;;  %348 = vmatpush.bf16.msra.mxu2 %v3089_v8  ;;  %v2503_v17 = vor.u32 %v3064_v15, %v2500_v16  ;;  %v3085_v19 = vld [vmem:[%s4333_s1 + $0x58] sm:$0xff]  ;;  %v3084_v21 = vld [vmem:[%s4333_s1 + $0x50] sm:$0xff]  ;;  %v3074_v22 = vld [vmem:[%s4333_s1] sm:$0xff] }
   0x8   :  { %522 = vmatpush.bf16.msrb.mxu1 %v3081_v0  ;;  %v2490_v23 = vld [vmem:[%s4334_s0] sm:$0xf]  ;;  %v3063_v24 = vld [vmem:[%s4334_s0 + $0x4] sm:$0xf0]  ;;  %v3066_v27 = vld [vmem:[%s4334_s0 + $0x24] sm:$0xf] }
   0x9   :  { %2572 = vmatmul.msk.bf16.vlgmr.msra.gmra.mxu1 %vm177_vm0, %v2495_v5  ;;  %v3083_v25 = vld [vmem:[%s4333_s1 + $0x48] sm:$0xff]  ;;  %v2491_v26 = vor.u32 %v3063_v24, %v2490_v23  ;;  %v2498_v30 = vld [vmem:[%s4334_s0 + $0x10] sm:$0xf]  ;;  %v3065_v31 = vld [vmem:[%s4334_s0 + $0x14] sm:$0xf0] }
   0xa   :  { %198 = vmatpush.bf16.msra.mxu0 %v3079_v9  ;;  %v2508_v28 = vld [vmem:[%s4334_s0 + $0x28] sm:$0xf0]  ;;  %v2499_v32 = vor.u32 %v3065_v31, %v2498_v30  ;;  %v3068_v33 = vld [vmem:[%s4334_s0 + $0x34] sm:$0xf]  ;;  %v2516_v34 = vld [vmem:[%s4334_s0 + $0x38] sm:$0xf0] }
   0xb   :  { %349 = vmatpush.bf16.msra.mxu2 %v3088_v10  ;;  %v2511_v29 = vor.u32 %v3066_v27, %v2508_v28  ;;  %v2519_v35 = vor.u32 %v3068_v33, %v2516_v34  ;;  %v2506_v36 = vld [vmem:[%s4334_s0 + $0x20] sm:$0xf]  ;;  %v3067_v37 = vld [vmem:[%s4334_s0 + $0x24] sm:$0xf0]  ;;  %v3070_v39 = vld [vmem:[%s4334_s0 + $0x44] sm:$0xf] }
   0xc   :  { %523 = vmatpush.bf16.msrb.mxu1 %v3080_v6  ;;  %v2507_v38 = vor.u32 %v3067_v37, %v2506_v36  ;;  %v2524_v40 = vld [vmem:[%s4334_s0 + $0x48] sm:$0xf0]  ;;  %v2514_v42 = vld [vmem:[%s4334_s0 + $0x30] sm:$0xf]  ;;  %v3069_v43 = vld [vmem:[%s4334_s0 + $0x34] sm:$0xf0] }
   0xd   :  { %v2527_v41 = vor.u32 %v3070_v39, %v2524_v40  ;;  %v2515_v44 = vor.u32 %v3069_v43, %v2514_v42  ;;  %v3072_v45 = vld [vmem:[%s4334_s0 + $0x54] sm:$0xf]  ;;  %v2532_v46 = vld [vmem:[%s4334_s0 + $0x58] sm:$0xf0]  ;;  %v2522_v48 = vld [vmem:[%s4334_s0 + $0x40] sm:$0xf] }
   0xe   :  { %199 = vmatpush.bf16.msra.mxu0 %v3078_v11  ;;  %v2535_v47 = vor.u32 %v3072_v45, %v2532_v46  ;;  %v3071_v49 = vld [vmem:[%s4334_s0 + $0x44] sm:$0xf0]  ;;  %v3092_v51 = vld [vmem:[%s4334_s0 + $0x64] sm:$0xf]  ;;  %v2654_v52 = vld [vmem:[%s4334_s0 + $0x68] sm:$0xf0] }
   0xf   :  { %350 = vmatpush.bf16.msra.mxu2 %v3087_v12  ;;  %v2523_v50 = vor.u32 %v3071_v49, %v2522_v48  ;;  %v2652_v53 = vld [vmem:[%s4334_s0 + $0x60] sm:$0xf]  ;;  %v3093_v54 = vld [vmem:[%s4334_s0 + $0x64] sm:$0xf0]  ;;  %v2657_v55 = vor.u32 %v3092_v51, %v2654_v52  ;;  %v2530_v57 = vld [vmem:[%s4334_s0 + $0x50] sm:$0xf] }
  0x10   :  { %524 = vmatpush.bf16.msrb.mxu1 %v3079_v9  ;;  %v2653_v56 = vor.u32 %v3093_v54, %v2652_v53  ;;  %v3073_v58 = vld [vmem:[%s4334_s0 + $0x54] sm:$0xf0]  ;;  %v3094_v60 = vld [vmem:[%s4334_s0 + $0x74] sm:$0xf]  ;;  %v2662_v61 = vld [vmem:[%s4334_s0 + $0x78] sm:$0xf0] }
  0x11   :  { %v2531_v59 = vor.u32 %v3073_v58, %v2530_v57  ;;  %v2660_v62 = vld [vmem:[%s4334_s0 + $0x70] sm:$0xf]  ;;  %v3095_v63 = vld [vmem:[%s4334_s0 + $0x74] sm:$0xf0]  ;;  %v2665_v0 = vor.u32 %v3094_v60, %v2662_v61  ;;  %v2670_v3 = vld [vmem:[%s4334_s0 + $0x88] sm:$0xf0] }
  0x12   :  { %200 = vmatpush.bf16.msra.mxu0 %v3077_v13  ;;  %v2668_v4 = vld [vmem:[%s4334_s0 + $0x80] sm:$0xf]  ;;  %v3097_v5 = vld [vmem:[%s4334_s0 + $0x84] sm:$0xf0]  ;;  %v3100_v23 = vld [vmem:[%s4334_s0 + $0xa4] sm:$0xf] }
  0x13   :  { %351 = vmatpush.bf16.msra.mxu2 %v3086_v14  ;;  %v2669_v7 = vor.u32 %v3097_v5, %v2668_v4  ;;  %v2686_v24 = vld [vmem:[%s4334_s0 + $0xa8] sm:$0xf0]  ;;  %v3102_v40 = vld [vmem:[%s4334_s0 + $0xb4] sm:$0xf]  ;;  %v2692_v42 = vld [vmem:[%s4334_s0 + $0xb0] sm:$0xf] }
  0x14   :  { %525 = vmatpush.bf16.msrb.mxu1 %v3078_v11  ;;  %v3098_v11 = vld [vmem:[%s4334_s0 + $0x94] sm:$0xf]  ;;  %v2689_v28 = vor.u32 %v3100_v23, %v2686_v24  ;;  %v3103_v43 = vld [vmem:[%s4334_s0 + $0xb4] sm:$0xf0] }
  0x15   :  { %v2693_v46 = vor.u32 %v3103_v43, %v2692_v42  ;;  %v3109_v43 = vld [vmem:[%s4336_s3 + $0x28] sm:$0xff] }
  0x16   :  { %2633 = vmatmul.msk.bf16.gmra.mxu3 %vm177_vm0, %v2503_v17  ;;  %201 = vmatpush.bf16.msra.mxu0 %v3076_v18 }
  0x17   :  { %352 = vmatpush.bf16.msra.mxu2 %v3085_v19 }
  0x18   :  { %526 = vmatpush.bf16.msrb.mxu1 %v3077_v13  ;;  %v2676_v13 = vld [vmem:[%s4334_s0 + $0x90] sm:$0xf] }
  0x19   :  { %2573 = vmatmul.msk.bf16.gmra.mxu1 %vm177_vm0, %v2503_v17 }
  0x1a   :  { %202 = vmatpush.bf16.msra.mxu0 %v3075_v20 }
  0x1b   :  { %353 = vmatpush.bf16.msra.mxu2 %v3084_v21 }
  0x1c   :  { %527 = vmatpush.bf16.msrb.mxu1 %v3076_v18 }
  0x1e   :  { %203 = vmatpush.bf16.msra.mxu0 %v3074_v22 }
  0x1f   :  { %354 = vmatpush.bf16.msra.mxu2 %v3083_v25 }
  0x20   :  { %528 = vmatpush.bf16.msrb.mxu1 %v3075_v20 }
  0x21   :  { %204 = vmatmul.bf16.vlgmr.msra.gmra.mxu0 %v2491_v26 }
  0x22   :  { %612 = vmatpush.bf16.msrb.mxu0 %v3090_v1  ;;  %355 = vmatmul.bf16.vlgmr.msra.gmra.mxu2 %v2491_v26  ;;  %v2661_v1 = vor.u32 %v3095_v63, %v2660_v62  ;;  %v3101_v26 = vld [vmem:[%s4334_s0 + $0xa4] sm:$0xf0] }
  0x23   :  { %658 = vmatpush.bf16.msrb.mxu2 %v3091_v2  ;;  %v3096_v2 = vld [vmem:[%s4334_s0 + $0x84] sm:$0xf] }
  0x24   :  { %529 = vmatpush.bf16.msrb.mxu1 %v3074_v22  ;;  %v2673_v6 = vor.u32 %v3096_v2, %v2670_v3 }
  0x26   :  { %613 = vmatpush.bf16.msrb.mxu0 %v3089_v8  ;;  %2634 = vmatmul.msk.bf16.gmra.mxu3 %vm177_vm0, %v2511_v29 }
  0x29   :  { %2574 = vmatmul.msk.bf16.gmra.mxu1 %vm177_vm0, %v2511_v29 }
  0x2a   :  { %614 = vmatpush.bf16.msrb.mxu0 %v3088_v10 }
  0x2e   :  { %615 = vmatpush.bf16.msrb.mxu0 %v3087_v12  ;;  %v2678_v12 = vld [vmem:[%s4334_s0 + $0x98] sm:$0xf0] }
  0x2f   :  { %v2681_v16 = vor.u32 %v3098_v11, %v2678_v12 }
  0x31   :  { %209 = vmatmul.bf16.gmra.mxu0 %v2499_v32 }
  0x32   :  { %616 = vmatpush.bf16.msrb.mxu0 %v3086_v14  ;;  %360 = vmatmul.bf16.gmra.mxu2 %v2499_v32  ;;  %v3099_v14 = vld [vmem:[%s4334_s0 + $0x94] sm:$0xf0] }
  0x33   :  { %v2677_v17 = vor.u32 %v3099_v14, %v2676_v13 }
  0x36   :  { %617 = vmatpush.bf16.msrb.mxu0 %v3085_v19  ;;  %2635 = vmatmul.msk.bf16.gmra.mxu3 %vm177_vm0, %v2519_v35 }
  0x39   :  { %2575 = vmatmul.msk.bf16.gmra.mxu1 %vm177_vm0, %v2519_v35 }
  0x3a   :  { %618 = vmatpush.bf16.msrb.mxu0 %v3084_v21 }
  0x3e   :  { %619 = vmatpush.bf16.msrb.mxu0 %v3083_v25  ;;  %v2684_v25 = vld [vmem:[%s4334_s0 + $0xa0] sm:$0xf] }
  0x3f   :  { %v2685_v29 = vor.u32 %v3101_v26, %v2684_v25 }
  0x41   :  { %214 = vmatmul.bf16.gmra.mxu0 %v2507_v38 }
  0x42   :  { %365 = vmatmul.bf16.gmra.mxu2 %v2507_v38 }
  0x46   :  { %2636 = vmatmul.msk.bf16.gmra.mxu3 %vm177_vm0, %v2527_v41 }
  0x49   :  { %2576 = vmatmul.msk.bf16.gmra.mxu1 %vm177_vm0, %v2527_v41  ;;  %v2694_v41 = vld [vmem:[%s4334_s0 + $0xb8] sm:$0xf0] }
  0x4a   :  { %v2697_v45 = vor.u32 %v3102_v40, %v2694_v41 }
  0x51   :  { %219 = vmatmul.bf16.gmra.mxu0 %v2515_v44 }
  0x52   :  { %370 = vmatmul.bf16.gmra.mxu2 %v2515_v44 }
  0x56   :  { %2637 = vmatmul.msk.bf16.gmra.mxu3 %vm177_vm0, %v2535_v47 }
  0x59   :  { %2577 = vmatmul.msk.bf16.gmra.mxu1 %vm177_vm0, %v2535_v47 }
  0x61   :  { %224 = vmatmul.bf16.gmra.mxu0 %v2523_v50 }
  0x62   :  { %375 = vmatmul.bf16.gmra.mxu2 %v2523_v50 }
  0x66   :  { %2698 = vmatmul.msk.bf16.vlgmr.msrb.gmra.mxu3 %vm177_vm0, %v2657_v55 }
  0x69   :  { %530 = vmatmul.bf16.vlgmr.msrb.gmra.mxu1 %v2653_v56 }
  0x71   :  { %229 = vmatmul.bf16.gmra.mxu0 %v2531_v59 }
  0x72   :  { %380 = vmatmul.bf16.gmra.mxu2 %v2531_v59 }
  0x76   :  { %2699 = vmatmul.msk.bf16.gmra.mxu3 %vm177_vm0, %v2665_v0 }
  0x79   :  { %535 = vmatmul.bf16.gmra.mxu1 %v2661_v1 }
  0x81   :  { %620 = vmatmul.bf16.vlgmr.msrb.gmra.mxu0 %v2653_v56 }
  0x82   :  { %2704 = vmatmul.msk.bf16.vlgmr.msrb.gmra.mxu2 %vm177_vm0, %v2657_v55 }
  0x86   :  { %v244_v8 = vpop.f32.mrf.mxu1  ;;  %2700 = vmatmul.msk.bf16.gmra.mxu3 %vm177_vm0, %v2673_v6 }
  0x89   :  { %540 = vmatmul.bf16.gmra.mxu1 %v2669_v7  ;;  %v395_v9 = vpop.f32.mrf.mxu3 }
  0x8e   :  { %v3447_v10 = vpop.f32.mrf.mxu1 }
  0x91   :  { %v3461_v15 = vpop.f32.mrf.mxu3  ;;  %625 = vmatmul.bf16.gmra.mxu0 %v2661_v1 }
  0x92   :  { %2705 = vmatmul.msk.bf16.gmra.mxu2 %vm177_vm0, %v2665_v0 }
  0x96   :  { %v249_v18 = vpop.f32.mrf.mxu1  ;;  %2701 = vmatmul.msk.bf16.gmra.mxu3 %vm177_vm0, %v2681_v16 }
  0x99   :  { %545 = vmatmul.bf16.gmra.mxu1 %v2677_v17  ;;  %v400_v19 = vpop.f32.mrf.mxu3 }
  0x9e   :  { %v3465_v20 = vpop.f32.mrf.mxu1  ;;  %v205_v21 = vpop.f32.mrf.mxu0 }
  0x9f   :  { %v3467_v22 = vadd.f32 %v244_v8, %v205_v21 }
  0xa1   :  { %v3481_v27 = vpop.f32.mrf.mxu3  ;;  %630 = vmatmul.bf16.gmra.mxu0 %v2669_v7 }
  0xa2   :  { %2706 = vmatmul.msk.bf16.gmra.mxu2 %vm177_vm0, %v2673_v6 }
  0xa5   :  { %v356_v31 = vpop.f32.mrf.mxu2 }
  0xa6   :  { %v254_v30 = vpop.f32.mrf.mxu1  ;;  %v3484_v32 = vadd.f32 %v395_v9, %v356_v31  ;;  %2702 = vmatmul.msk.bf16.gmra.mxu3 %vm177_vm0, %v2689_v28  ;;  %v3487_v33 = vpop.f32.mrf.mxu0 }
  0xa8   :  { %v425_v34 = vmax.f32 %v3467_v22, %v3484_v32  ;;  %v247_v22 = vadd.f32 %v3447_v10, %v3487_v33 }
  0xa9   :  { %550 = vmatmul.bf16.gmra.mxu1 %v2685_v29  ;;  %v405_v35 = vpop.f32.mrf.mxu3 }
  0xad   :  { %v3493_v37 = vpop.f32.mrf.mxu2 }
  0xae   :  { %v3491_v36 = vpop.f32.mrf.mxu1  ;;  %v210_v38 = vpop.f32.mrf.mxu0 }
  0xaf   :  { %v3495_v39 = vadd.f32 %v249_v18, %v210_v38 }
  0xb1   :  { %v3509_v44 = vpop.f32.mrf.mxu3  ;;  %635 = vmatmul.bf16.gmra.mxu0 %v2677_v17 }
  0xb2   :  { %2707 = vmatmul.msk.bf16.gmra.mxu2 %vm177_vm0, %v2681_v16 }
  0xb5   :  { %v361_v48 = vpop.f32.mrf.mxu2 }
  0xb6   :  { %v259_v47 = vpop.f32.mrf.mxu1  ;;  %v3512_v49 = vadd.f32 %v400_v19, %v361_v48  ;;  %2703 = vmatmul.msk.bf16.gmra.mxu3 %vm177_vm0, %v2697_v45  ;;  %v3515_v50 = vpop.f32.mrf.mxu0 }
  0xb8   :  { %v427_v51 = vmax.f32 %v3495_v39, %v3512_v49 }
  0xb9   :  { %555 = vmatmul.bf16.gmra.mxu1 %v2693_v46  ;;  %v410_v52 = vpop.f32.mrf.mxu3 }
  0xbd   :  { %v3521_v54 = vpop.f32.mrf.mxu2 }
  0xbe   :  { %v3519_v53 = vpop.f32.mrf.mxu1  ;;  %v215_v55 = vpop.f32.mrf.mxu0 }
  0xbf   :  { %v3523_v56 = vadd.f32 %v254_v30, %v215_v55 }
  0xc1   :  { %v3525_v57 = vpop.f32.mrf.mxu3  ;;  %640 = vmatmul.bf16.gmra.mxu0 %v2685_v29  ;;  %v3111_v29 = vld [vmem:[%s4336_s3 + $0x38] sm:$0xff] }
  0xc2   :  { %2708 = vmatmul.msk.bf16.gmra.mxu2 %vm177_vm0, %v2689_v28  ;;  %1557 = vmatpush.bf16.msra.mxu1 %v3111_v29 }
  0xc5   :  { %v366_v59 = vpop.f32.mrf.mxu2 }
  0xc6   :  { %v264_v58 = vpop.f32.mrf.mxu1  ;;  %v3528_v60 = vadd.f32 %v405_v35, %v366_v59  ;;  %v3530_v61 = vpop.f32.mrf.mxu0  ;;  %v3110_v35 = vld [vmem:[%s4336_s3 + $0x30] sm:$0xff] }
  0xc7   :  { %1558 = vmatpush.bf16.msra.mxu1 %v3110_v35  ;;  %v3104_v35 = vld [vmem:[%s4336_s3] sm:$0xff] }
  0xc8   :  { %v429_v62 = vmax.f32 %v3523_v56, %v3528_v60 }
  0xc9   :  { %v415_v63 = vpop.f32.mrf.mxu3 }
  0xcb   :  { %1559 = vmatpush.bf16.msra.mxu1 %v3109_v43 }
  0xcd   :  { %v3536_v1 = vpop.f32.mrf.mxu2 }
  0xce   :  { %v3534_v0 = vpop.f32.mrf.mxu1  ;;  %v220_v2 = vpop.f32.mrf.mxu0 }
  0xcf   :  { %v3538_v3 = vadd.f32 %v259_v47, %v220_v2 }
  0xd1   :  { %v3540_v4 = vpop.f32.mrf.mxu3  ;;  %645 = vmatmul.bf16.gmra.mxu0 %v2693_v46  ;;  %v3108_v46 = vld [vmem:[%s4336_s3 + $0x20] sm:$0xff] }
  0xd2   :  { %2709 = vmatmul.msk.bf16.gmra.mxu2 %vm177_vm0, %v2697_v45  ;;  %1560 = vmatpush.bf16.msra.mxu1 %v3108_v46 }
  0xd5   :  { %v371_v6 = vpop.f32.mrf.mxu2 }
  0xd6   :  { %v269_v5 = vpop.f32.mrf.mxu1  ;;  %v3543_v7 = vadd.f32 %v410_v52, %v371_v6  ;;  %v3545_v8 = vpop.f32.mrf.mxu0 }
  0xd8   :  { %v431_v9 = vmax.f32 %v3538_v3, %v3543_v7 }
  0xd9   :  { %v420_v11 = vpop.f32.mrf.mxu3 }
  0xdd   :  { %v3549_v12 = vpop.f32.mrf.mxu2 }
  0xde   :  { %v225_v13 = vpop.f32.mrf.mxu0  ;;  %v3551_v14 = vpop.f32.mrf.mxu1 }
  0xdf   :  { %v3553_v16 = vadd.f32 %v264_v58, %v225_v13  ;;  %v3107_v58 = vld [vmem:[%s4336_s3 + $0x18] sm:$0xff]  ;;  %v3599_v13 = vld [vmem:[%s4335_s2] ss:$0 sm:$0xff] }
  0xe0   :  { %1561 = vmatpush.bf16.msra.mxu1 %v3107_v58 }
  0xe1   :  { %v3555_v17 = vpop.f32.mrf.mxu3 }
  0xe5   :  { %v376_v18 = vpop.f32.mrf.mxu2 }
  0xe6   :  { %v3557_v19 = vadd.f32 %v415_v63, %v376_v18  ;;  %v3559_v21 = vpop.f32.mrf.mxu0  ;;  %v531_v24 = vpop.f32.mrf.mxu1  ;;  %v3106_v63 = vld [vmem:[%s4336_s3 + $0x10] sm:$0xff] }
  0xe7   :  { %1562 = vmatpush.bf16.msra.mxu1 %v3106_v63 }
  0xe8   :  { %v433_v23 = vmax.f32 %v3553_v16, %v3557_v19 }
  0xe9   :  { %v570_v25 = vpop.f32.mrf.mxu3 }
  0xea   :  { %v571_v59 = vadd.f32 %v570_v25, %v531_v24  ;;  %v3105_v24 = vld [vmem:[%s4336_s3 + $0x8] sm:$0xff] }
  0xeb   :  { %1563 = vmatpush.bf16.msra.mxu1 %v3105_v24 }
  0xed   :  { %v3563_v26 = vpop.f32.mrf.mxu2 }
  0xee   :  { %v230_v28 = vpop.f32.mrf.mxu0  ;;  %v533_v31 = vpop.f32.mrf.mxu1 }
  0xef   :  { %v3568_v30 = vadd.f32 %v269_v5, %v230_v28  ;;  %v600_v5 = vmax.f32 %v425_v34, %v571_v59  ;;  %v398_v28 = vadd.f32 %v3461_v15, %v3493_v37  ;;  %1564 = vmatpush.bf16.msra.mxu1 %v3104_v35  ;;  %v252_v35 = vadd.f32 %v3465_v20, %v3515_v50 }
  0xf1   :  { %v572_v38 = vpop.f32.mrf.mxu3 }
  0xf2   :  { %v573_v32 = vadd.f32 %v572_v38, %v533_v31 }
  0xf5   :  { %v381_v40 = vpop.f32.mrf.mxu2 }
  0xf6   :  { %v3573_v41 = vadd.f32 %v420_v11, %v381_v40  ;;  %v3575_v42 = vpop.f32.mrf.mxu0  ;;  %v536_v47 = vpop.f32.mrf.mxu1  ;;  %v426_v40 = vmax.f32 %v247_v22, %v398_v28  ;;  %v403_v22 = vadd.f32 %v3481_v27, %v3521_v54 }
  0xf8   :  { %v435_v45 = vmax.f32 %v3568_v30, %v3573_v41 }
  0xf9   :  { %v575_v48 = vpop.f32.mrf.mxu3 }
  0xfa   :  { %v576_v31 = vadd.f32 %v575_v48, %v536_v47 }
  0xfc   :  { %v602_v28 = vmax.f32 %v427_v51, %v576_v31 }
  0xfd   :  { %v3585_v52 = vpop.f32.mrf.mxu2 }
  0xfe   :  { %v621_v55 = vpop.f32.mrf.mxu0  ;;  %v538_v6 = vpop.f32.mrf.mxu1 }
 0x101   :  { %v577_v25 = vpop.f32.mrf.mxu3 }
 0x105   :  { %v660_v2 = vpop.f32.mrf.mxu2 }
 0x106   :  { %v661_v11 = vadd.f32 %v660_v2, %v621_v55  ;;  %v623_v18 = vpop.f32.mrf.mxu0  ;;  %v601_v55 = vmax.f32 %v426_v40, %v573_v32  ;;  %v541_v63 = vpop.f32.mrf.mxu1  ;;  %v578_v40 = vadd.f32 %v577_v25, %v538_v6 }
 0x108   :  { %v690_v29 = vmax.f32 %v600_v5, %v661_v11 }
 0x109   :  { %v580_v33 = vpop.f32.mrf.mxu3 }
 0x10a   :  { %v706_v34 = vadd.f32 %v3599_v13, %v690_v29 }
 0x10c   :  { %v718_v43 = vmax.f32 %v706_v34, 0.0 }
 0x10d   :  { %v662_v46 = vpop.f32.mrf.mxu2 }
 0x10e   :  { %v730_v58 = vpack.c.bf16 %v718_v43, %v718_v43  ;;  %v663_v59 = vadd.f32 %v662_v46, %v623_v18  ;;  %v626_v15 = vpop.f32.mrf.mxu0 }
 0x110   :  { %v754_v37 = vrot.slane %v730_v58, 2  ;;  %v691_v10 = vmax.f32 %v601_v55, %v663_v59  ;;  %v543_v55 = vpop.f32.mrf.mxu1 }
 0x111   :  { %v582_v51 = vpop.f32.mrf.mxu3 }
 0x112   :  { %v3613_v38 = vsel %vm766_vm1, %v730_v58, %v754_v37  ;;  %v771_v2 = vsel %vm770_vm2, %v730_v58, %v754_v37  ;;  %v707_v5 = vadd.f32 %v3599_v13, %v691_v10  ;;  %v428_v58 = vmax.f32 %v252_v35, %v403_v22 }
 0x113   :  { %v3617_v11 = vrot.slane %v771_v2, 2  ;;  %840 = vst [vmem:[#allocation1] ss:$4 sm:$0xff] %v3613_v38  ;;  %v581_v37 = vadd.f32 %v580_v33, %v541_v63  ;;  %v257_v35 = vadd.f32 %v3491_v36, %v3530_v61 }
 0x114   :  { %v719_v18 = vmax.f32 %v707_v5, 0.0  ;;  %v603_v54 = vmax.f32 %v428_v58, %v578_v40  ;;  %v583_v40 = vadd.f32 %v582_v51, %v543_v55 }
 0x115   :  { %843 = vst [vmem:[#allocation1 + $0x1] ss:$4 sm:$0xff] %v3617_v11  ;;  %v665_v24 = vpop.f32.mrf.mxu2 }
 0x116   :  { %v731_v47 = vpack.c.bf16 %v719_v18, %v719_v18  ;;  %v666_v48 = vadd.f32 %v665_v24, %v626_v15  ;;  %v628_v29 = vpop.f32.mrf.mxu0 }
 0x118   :  { %v755_v32 = vrot.slane %v731_v47, 2  ;;  %v692_v34 = vmax.f32 %v602_v28, %v666_v48  ;;  %v546_v5 = vpop.f32.mrf.mxu1 }
 0x119   :  { %v585_v24 = vpop.f32.mrf.mxu3 }
 0x11a   :  { %v3629_v43 = vsel %vm766_vm1, %v731_v47, %v755_v32  ;;  %v777_v46 = vsel %vm770_vm2, %v731_v47, %v755_v32  ;;  %v708_v39 = vadd.f32 %v3599_v13, %v692_v34  ;;  %v604_v47 = vmax.f32 %v429_v62, %v581_v37 }
 0x11b   :  { %v3633_v49 = vrot.slane %v777_v46, 2 }
 0x11c   :  { %v720_v59 = vmax.f32 %v708_v39, 0.0  ;;  %v844_v22 = vld.sshfl [vmem:[#allocation1] sm:$0xff pattern:$0x73625140] }
 0x11d   :  { %848 = vst [vmem:[#allocation1 + $0x20] ss:$4 sm:$0xff] %v3633_v49  ;;  %v667_v27 = vpop.f32.mrf.mxu2 }
 0x11e   :  { %v732_v15 = vpack.c.bf16 %v720_v59, %v720_v59  ;;  %v668_v20 = vadd.f32 %v667_v27, %v628_v29  ;;  %v631_v50 = vpop.f32.mrf.mxu0  ;;  %v408_v29 = vadd.f32 %v3509_v44, %v3536_v1  ;;  %v1153_v44 = vunpack.c.l.b16 %v844_v22 }
 0x120   :  { %v756_v6 = vrot.slane %v732_v15, 2  ;;  %v693_v25 = vmax.f32 %v603_v54, %v668_v20  ;;  %v430_v58 = vmax.f32 %v257_v35, %v408_v29  ;;  %v548_v51 = vpop.f32.mrf.mxu1  ;;  %v262_v35 = vadd.f32 %v3519_v53, %v3545_v8 }
 0x121   :  { %v587_v20 = vpop.f32.mrf.mxu3 }
 0x122   :  { %v3637_v10 = vsel %vm766_vm1, %v732_v15, %v756_v6  ;;  %v3640_v31 = vsel %vm770_vm2, %v732_v15, %v756_v6  ;;  %v709_v2 = vadd.f32 %v3599_v13, %v693_v25  ;;  %v605_v55 = vmax.f32 %v430_v58, %v583_v40 }
 0x123   :  { %850 = vst [vmem:[#allocation1 + $0x21] ss:$4 sm:$0xff] %v3637_v10  ;;  %v586_v25 = vadd.f32 %v585_v24, %v546_v5  ;;  %v413_v24 = vadd.f32 %v3525_v57, %v3549_v12 }
 0x124   :  { %v721_v18 = vmax.f32 %v709_v2, 0.0 }
 0x125   :  { %v670_v28 = vpop.f32.mrf.mxu2 }
 0x126   :  { %v733_v48 = vpack.c.bf16 %v721_v18, %v721_v18  ;;  %v671_v63 = vadd.f32 %v670_v28, %v631_v50  ;;  %v633_v33 = vpop.f32.mrf.mxu0 }
 0x128   :  { %v757_v32 = vrot.slane %v733_v48, 2  ;;  %v694_v34 = vmax.f32 %v604_v47, %v671_v63  ;;  %v606_v63 = vmax.f32 %v431_v9, %v586_v25  ;;  %v551_v22 = vpop.f32.mrf.mxu1  ;;  %v432_v9 = vmax.f32 %v262_v35, %v413_v24 }
 0x129   :  { %v590_v40 = vpop.f32.mrf.mxu3 }
 0x12a   :  { %v851_v46 = vld.sshfl [vmem:[#allocation1 + $0x20] sm:$0xff pattern:$0x73625140]  ;;  %v3652_v39 = vsel %vm766_vm1, %v733_v48, %v757_v32  ;;  %v789_v56 = vsel %vm770_vm2, %v733_v48, %v757_v32  ;;  %v710_v60 = vadd.f32 %v3599_v13, %v694_v34 }
 0x12b   :  { %v3656_v62 = vrot.slane %v789_v56, 2  ;;  %853 = vst [vmem:[#allocation1] ss:$4 sm:$0xff] %v3652_v39  ;;  %v1158_v1 = vunpack.c.l.b16 %v851_v46  ;;  %v588_v46 = vadd.f32 %v587_v20, %v548_v51 }
 0x12c   :  { %v722_v59 = vmax.f32 %v710_v60, 0.0 }
 0x12d   :  { %855 = vst [vmem:[#allocation1 + $0x1] ss:$4 sm:$0xff] %v3656_v62  ;;  %v672_v36 = vpop.f32.mrf.mxu2  ;;  %v1277_v61 = vpack.c.b16 %v1158_v1, %v1153_v44  ;;  %v607_v60 = vmax.f32 %v432_v9, %v588_v46 }
 0x12e   :  { %v734_v27 = vpack.c.bf16 %v722_v59, %v722_v59  ;;  %v673_v54 = vadd.f32 %v672_v36, %v633_v33  ;;  %v636_v15 = vpop.f32.mrf.mxu0  ;;  %v591_v36 = vadd.f32 %v590_v40, %v551_v22  ;;  %v267_v22 = vadd.f32 %v3534_v0, %v3559_v21 }
 0x12f   :  { %1565 = vmatmul.bf16.vlgmr.msra.gmra.mxu1 %v1277_v61 }
 0x130   :  { %v758_v50 = vrot.slane %v734_v27, 2  ;;  %v695_v6 = vmax.f32 %v605_v55, %v673_v54  ;;  %v553_v55 = vpop.f32.mrf.mxu1 }
 0x132   :  { %v3661_v37 = vsel %vm766_vm1, %v734_v27, %v758_v50  ;;  %v795_v2 = vsel %vm770_vm2, %v734_v27, %v758_v50  ;;  %v711_v18 = vadd.f32 %v3599_v13, %v695_v6 }
 0x133   :  { %v3665_v28 = vrot.slane %v795_v2, 2 }
 0x134   :  { %v723_v47 = vmax.f32 %v711_v18, 0.0  ;;  %v856_v53 = vld.sshfl [vmem:[#allocation1] sm:$0xff pattern:$0x73625140] }
 0x135   :  { %859 = vst [vmem:[#allocation1 + $0x20] ss:$4 sm:$0xff] %v3665_v28  ;;  %v675_v48 = vpop.f32.mrf.mxu2  ;;  %v1163_v50 = vunpack.c.l.b16 %v856_v53 }
 0x136   :  { %v735_v33 = vpack.c.bf16 %v723_v47, %v723_v47  ;;  %v676_v29 = vadd.f32 %v675_v48, %v636_v15  ;;  %v638_v5 = vpop.f32.mrf.mxu0  ;;  %v592_v15 = vpop.f32.mrf.mxu3  ;;  %v608_v47 = vmax.f32 %v433_v23, %v591_v36  ;;  %v3119_v36 = vld [vmem:[%s4336_s3 + $0x78] sm:$0xff] }
 0x137   :  { %1586 = vmatpush.bf16.msra.mxu3 %v3119_v36  ;;  %v3792_v36 = vrot.slane %v3640_v31, 2 }
 0x138   :  { %v759_v32 = vrot.slane %v735_v33, 2  ;;  %v696_v34 = vmax.f32 %v606_v63, %v676_v29  ;;  %v556_v35 = vpop.f32.mrf.mxu1 }
 0x13a   :  { %v3676_v56 = vsel %vm766_vm1, %v735_v33, %v759_v32  ;;  %v3679_v3 = vsel %vm770_vm2, %v735_v33, %v759_v32  ;;  %v712_v7 = vadd.f32 %v3599_v13, %v696_v34  ;;  %v418_v33 = vadd.f32 %v3540_v4, %v3563_v26 }
 0x13b   :  { %860 = vst [vmem:[#allocation1 + $0x21] ss:$4 sm:$0xff] %v3676_v56  ;;  %v593_v32 = vadd.f32 %v592_v15, %v553_v55 }
 0x13c   :  { %v724_v57 = vmax.f32 %v712_v7, 0.0  ;;  %v434_v34 = vmax.f32 %v267_v22, %v418_v33 }
 0x13d   :  { %v677_v12 = vpop.f32.mrf.mxu2 }
 0x13e   :  { %v736_v44 = vpack.c.bf16 %v724_v57, %v724_v57  ;;  %v678_v1 = vadd.f32 %v677_v12, %v638_v5  ;;  %v641_v58 = vpop.f32.mrf.mxu0  ;;  %v595_v26 = vpop.f32.mrf.mxu3  ;;  %v609_v46 = vmax.f32 %v434_v34, %v593_v32 }
 0x13f   :  { %v596_v57 = vadd.f32 %v595_v26, %v556_v35  ;;  %v3116_v26 = vld [vmem:[%s4336_s3 + $0x60] sm:$0xff] }
 0x140   :  { %v760_v8 = vrot.slane %v736_v44, 2  ;;  %v697_v59 = vmax.f32 %v607_v60, %v678_v1 }
 0x141   :  { %v610_v53 = vmax.f32 %v435_v45, %v596_v57  ;;  %v3115_v57 = vld [vmem:[%s4336_s3 + $0x58] sm:$0xff] }
 0x142   :  { %v861_v61 = vld.sshfl [vmem:[#allocation1 + $0x20] sm:$0xff pattern:$0x73625140]  ;;  %v3684_v51 = vsel %vm766_vm1, %v736_v44, %v760_v8  ;;  %v807_v27 = vsel %vm770_vm2, %v736_v44, %v760_v8  ;;  %v713_v54 = vadd.f32 %v3599_v13, %v697_v59 }
 0x143   :  { %v3688_v20 = vrot.slane %v807_v27, 2  ;;  %863 = vst [vmem:[#allocation1] ss:$4 sm:$0xff] %v3684_v51  ;;  %v1168_v6 = vunpack.c.l.b16 %v861_v61  ;;  %v558_v61 = vpop.f32.mrf.mxu1  ;;  %v423_v27 = vadd.f32 %v3555_v17, %v3585_v52  ;;  %v3118_v17 = vld [vmem:[%s4336_s3 + $0x70] sm:$0xff] }
 0x144   :  { %v725_v25 = vmax.f32 %v713_v54, 0.0  ;;  %1587 = vmatpush.bf16.msra.mxu3 %v3118_v17 }
 0x145   :  { %865 = vst [vmem:[#allocation1 + $0x1] ss:$4 sm:$0xff] %v3688_v20  ;;  %v680_v2 = vpop.f32.mrf.mxu2  ;;  %v1282_v18 = vpack.c.b16 %v1168_v6, %v1163_v50  ;;  %v272_v6 = vadd.f32 %v3551_v14, %v3575_v42 }
 0x146   :  { %v3695_v48 = vpack.c.bf16 %v725_v25, %v725_v25  ;;  %v681_v63 = vadd.f32 %v680_v2, %v641_v58  ;;  %v643_v24 = vpop.f32.mrf.mxu0  ;;  %v597_v55 = vpop.f32.mrf.mxu3 }
 0x147   :  { %1570 = vmatmul.bf16.gmra.mxu1 %v1282_v18  ;;  %v598_v30 = vadd.f32 %v597_v55, %v558_v61  ;;  %v436_v14 = vmax.f32 %v272_v6, %v423_v27  ;;  %v3125_v6 = vld [vmem:[%s4336_s3 + $0xa8] sm:$0xff] }
 0x148   :  { %v761_v29 = vrot.slane %v3695_v48, 2  ;;  %v698_v5 = vmax.f32 %v608_v47, %v681_v63 }
 0x14a   :  { %v813_v16 = vsel %vm770_vm2, %v3695_v48, %v761_v29  ;;  %v714_v19 = vadd.f32 %v3599_v13, %v698_v5  ;;  %v3805_v31 = vsel %vm766_vm1, %v3695_v48, %v761_v29  ;;  %v3124_v48 = vld [vmem:[%s4336_s3 + $0xa0] sm:$0xff] }
 0x14b   :  { %v3707_v23 = vrot.slane %v813_v16, 2  ;;  %v3117_v16 = vld [vmem:[%s4336_s3 + $0x68] sm:$0xff] }
 0x14c   :  { %v726_v4 = vmax.f32 %v714_v19, 0.0  ;;  %v866_v54 = vld.sshfl [vmem:[#allocation1] sm:$0xff pattern:$0x73625140]  ;;  %1588 = vmatpush.bf16.msra.mxu3 %v3117_v16 }
 0x14d   :  { %869 = vst [vmem:[#allocation1 + $0x20] ss:$4 sm:$0xff] %v3707_v23  ;;  %v682_v40 = vpop.f32.mrf.mxu2  ;;  %v1173_v18 = vunpack.c.l.b16 %v866_v54  ;;  %v3126_v54 = vld [vmem:[%s4336_s3 + $0xb0] sm:$0xff] }
 0x14e   :  { %v3710_v7 = vpack.c.bf16 %v726_v4, %v726_v4  ;;  %v683_v0 = vadd.f32 %v682_v40, %v643_v24  ;;  %v646_v44 = vpop.f32.mrf.mxu0  ;;  %v611_v24 = vmax.f32 %v436_v14, %v598_v30 }
 0x150   :  { %v762_v21 = vrot.slane %v3710_v7, 2  ;;  %v699_v9 = vmax.f32 %v609_v46, %v683_v0  ;;  %1589 = vmatpush.bf16.msra.mxu3 %v3116_v26 }
 0x152   :  { %v3717_v12 = vsel %vm766_vm1, %v3710_v7, %v762_v21  ;;  %v715_v60 = vadd.f32 %v3599_v13, %v699_v9 }
 0x153   :  { %870 = vst [vmem:[#allocation1 + $0x21] ss:$4 sm:$0xff] %v3717_v12 }
 0x154   :  { %v727_v1 = vmax.f32 %v715_v60, 0.0  ;;  %1590 = vmatpush.bf16.msra.mxu3 %v3115_v57 }
 0x155   :  { %v685_v58 = vpop.f32.mrf.mxu2 }
 0x156   :  { %v739_v8 = vpack.c.bf16 %v727_v1, %v727_v1  ;;  %v686_v59 = vadd.f32 %v685_v58, %v646_v44  ;;  %v648_v63 = vpop.f32.mrf.mxu0  ;;  %v3114_v44 = vld [vmem:[%s4336_s3 + $0x50] sm:$0xff]  ;;  %v3113_v58 = vld [vmem:[%s4336_s3 + $0x48] sm:$0xff] }
 0x158   :  { %v763_v15 = vrot.slane %v739_v8, 2  ;;  %v700_v50 = vmax.f32 %v610_v53, %v686_v59  ;;  %1591 = vmatpush.bf16.msra.mxu3 %v3114_v44  ;;  %v3112_v59 = vld [vmem:[%s4336_s3 + $0x40] sm:$0xff] }
 0x15a   :  { %v871_v41 = vld.sshfl [vmem:[#allocation1 + $0x20] sm:$0xff pattern:$0x73625140]  ;;  %v3732_v45 = vsel %vm766_vm1, %v739_v8, %v763_v15  ;;  %v825_v25 = vsel %vm770_vm2, %v739_v8, %v763_v15  ;;  %v716_v2 = vadd.f32 %v3599_v13, %v700_v50  ;;  %v3127_v8 = vld [vmem:[%s4336_s3 + $0xb8] sm:$0xff] }
 0x15b   :  { %v3739_v52 = vrot.slane %v825_v25, 2  ;;  %873 = vst [vmem:[#allocation1] ss:$4 sm:$0xff] %v3732_v45  ;;  %v1178_v47 = vunpack.c.l.b16 %v871_v41  ;;  %1615 = vmatpush.bf16.msra.mxu0 %v3127_v8  ;;  %v3813_v25 = vrot.slane %v3679_v3, 2  ;;  %v3123_v3 = vld [vmem:[%s4336_s3 + $0x98] sm:$0xff] }
 0x15c   :  { %v728_v42 = vmax.f32 %v716_v2, 0.0  ;;  %1592 = vmatpush.bf16.msra.mxu3 %v3113_v58 }
 0x15d   :  { %875 = vst [vmem:[#allocation1 + $0x1] ss:$4 sm:$0xff] %v3739_v52  ;;  %v687_v33 = vpop.f32.mrf.mxu2  ;;  %v1287_v5 = vpack.c.b16 %v1178_v47, %v1173_v18 }
 0x15e   :  { %v3743_v22 = vpack.c.bf16 %v728_v42, %v728_v42  ;;  %v688_v32 = vadd.f32 %v687_v33, %v648_v63 }
 0x15f   :  { %1575 = vmatmul.bf16.gmra.mxu1 %v1287_v5  ;;  %1616 = vmatpush.bf16.msra.mxu0 %v3126_v54  ;;  %v819_v5 = vsel %vm770_vm2, %v3710_v7, %v762_v21 }
 0x160   :  { %v764_v19 = vrot.slane %v3743_v22, 2  ;;  %v701_v34 = vmax.f32 %v611_v24, %v688_v32  ;;  %1593 = vmatpush.bf16.msra.mxu3 %v3112_v59 }
 0x162   :  { %v831_v35 = vsel %vm770_vm2, %v3743_v22, %v764_v19  ;;  %v717_v4 = vadd.f32 %v3599_v13, %v701_v34  ;;  %v3836_v24 = vsel %vm766_vm1, %v3743_v22, %v764_v19  ;;  %v3122_v34 = vld [vmem:[%s4336_s3 + $0x90] sm:$0xff]  ;;  %v3121_v19 = vld [vmem:[%s4336_s3 + $0x88] sm:$0xff] }
 0x163   :  { %v3757_v46 = vrot.slane %v831_v35, 2  ;;  %1617 = vmatpush.bf16.msra.mxu0 %v3125_v6  ;;  %v3842_v35 = vrot.slane %v819_v5, 2  ;;  %v3134_v6 = vld [vmem:[%s4336_s3 + $0xf0] sm:$0xff] }
 0x164   :  { %v876_v40 = vld.sshfl [vmem:[#allocation1] sm:$0xff pattern:$0x73625140]  ;;  %v729_v0 = vmax.f32 %v717_v4, 0.0 }
 0x165   :  { %883 = vst [vmem:[#allocation1] ss:$4 sm:$0xff] %v3613_v38  ;;  %v1183_v61 = vunpack.c.l.b16 %v876_v40 }
 0x166   :  { %885 = vst [vmem:[#allocation1 + $0x1] ss:$4 sm:$0xff] %v3617_v11  ;;  %v3761_v9 = vpack.c.bf16 %v729_v0, %v729_v0 }
 0x167   :  { %887 = vst [vmem:[#allocation1 + $0x2] ss:$4 sm:$0xff] %v3629_v43  ;;  %1618 = vmatpush.bf16.msra.mxu0 %v3124_v48  ;;  %v3133_v48 = vld [vmem:[%s4336_s3 + $0xe8] sm:$0xff] }
 0x168   :  { %879 = vst [vmem:[#allocation1 + $0x20] ss:$4 sm:$0xff] %v3757_v46  ;;  %v765_v13 = vrot.slane %v3761_v9, 2 }
 0x16a   :  { %v3773_v60 = vsel %vm766_vm1, %v3761_v9, %v765_v13  ;;  %v837_v44 = vsel %vm770_vm2, %v3761_v9, %v765_v13 }
 0x16b   :  { %880 = vst [vmem:[#allocation1 + $0x21] ss:$4 sm:$0xff] %v3773_v60  ;;  %1619 = vmatpush.bf16.msra.mxu0 %v3123_v3  ;;  %v3862_v8 = vrot.slane %v837_v44, 2  ;;  %v3141_v44 = vld [vmem:[%s4336_s3 + $0x128] sm:$0xff] }
 0x16e   :  { %v888_v1 = vld.sshfl [vmem:[#allocation1] sm:$0xff pattern:$0x73625140] }
 0x16f   :  { %897 = vst [vmem:[#allocation1] ss:$4 sm:$0xff] %v3652_v39  ;;  %v926_v15 = vshll.u32 %v888_v1, 16  ;;  %v924_v2 = vshrl.u32 %v888_v1, 16  ;;  %1620 = vmatpush.bf16.msra.mxu0 %v3122_v34  ;;  %v3120_v1 = vld [vmem:[%s4336_s3 + $0x80] sm:$0xff] }
 0x170   :  { %898 = vst [vmem:[#allocation1 + $0x1] ss:$4 sm:$0xff] %v3656_v62 }
 0x171   :  { %899 = vst [vmem:[#allocation1 + $0x2] ss:$4 sm:$0xff] %v3661_v37  ;;  %v928_v30 = vrot.slane %v926_v15, 1 }
 0x172   :  { %v881_v53 = vld.sshfl [vmem:[#allocation1 + $0x20] sm:$0xff pattern:$0x73625140] }
 0x173   :  { %890 = vst [vmem:[#allocation1 + $0x20] ss:$4 sm:$0xff] %v3633_v49  ;;  %v1188_v55 = vunpack.c.l.b16 %v881_v53  ;;  %v929_v29 = vor.u32 %v928_v30, %v924_v2  ;;  %1621 = vmatpush.bf16.msra.mxu0 %v3121_v19 }
 0x174   :  { %892 = vst [vmem:[#allocation1 + $0x21] ss:$4 sm:$0xff] %v3637_v10 }
 0x175   :  { %895 = vst [vmem:[#allocation1 + $0x22] ss:$4 sm:$0xff] %v3792_v36  ;;  %v1292_v27 = vpack.c.b16 %v1188_v55, %v1183_v61  ;;  %v1154_v63 = vunpack.c.l.b16 %v929_v29 }
 0x177   :  { %1580 = vmatmul.bf16.gmra.mxu1 %v1292_v27  ;;  %1622 = vmatpush.bf16.msra.mxu0 %v3120_v1  ;;  %v3135_v27 = vld [vmem:[%s4336_s3 + $0xf8] sm:$0xff] }
 0x178   :  { %v900_v50 = vld.sshfl [vmem:[#allocation1] sm:$0xff pattern:$0x73625140]  ;;  %1644 = vmatpush.bf16.msra.mxu2 %v3135_v27 }
 0x179   :  { %906 = vst [vmem:[#allocation1] ss:$4 sm:$0xff] %v3684_v51  ;;  %v938_v7 = vshll.u32 %v900_v50, 16  ;;  %v936_v0 = vshrl.u32 %v900_v50, 16  ;;  %v3128_v27 = vld [vmem:[%s4336_s3 + $0xc0] sm:$0xff] }
 0x17a   :  { %907 = vst [vmem:[#allocation1 + $0x1] ss:$4 sm:$0xff] %v3688_v20 }
 0x17b   :  { %908 = vst [vmem:[#allocation1 + $0x2] ss:$4 sm:$0xff] %v3805_v31  ;;  %v940_v4 = vrot.slane %v938_v7, 1 }
 0x17c   :  { %v896_v41 = vld.sshfl [vmem:[#allocation1 + $0x20] sm:$0xff pattern:$0x73625140]  ;;  %1645 = vmatpush.bf16.msra.mxu2 %v3134_v6  ;;  %v3139_v6 = vld [vmem:[%s4336_s3 + $0x118] sm:$0xff] }
 0x17d   :  { %901 = vst [vmem:[#allocation1 + $0x20] ss:$4 sm:$0xff] %v3665_v28  ;;  %v932_v17 = vshll.u32 %v896_v41, 16  ;;  %v930_v18 = vshrl.u32 %v896_v41, 16  ;;  %v941_v58 = vor.u32 %v940_v4, %v936_v0  ;;  %v3130_v4 = vld [vmem:[%s4336_s3 + $0xd0] sm:$0xff] }
 0x17e   :  { %902 = vst [vmem:[#allocation1 + $0x21] ss:$4 sm:$0xff] %v3676_v56 }
 0x17f   :  { %904 = vst [vmem:[#allocation1 + $0x22] ss:$4 sm:$0xff] %v3813_v25  ;;  %v934_v47 = vrot.slane %v932_v17, 1  ;;  %v1164_v61 = vunpack.c.l.b16 %v941_v58 }
 0x180   :  { %1646 = vmatpush.bf16.msra.mxu2 %v3133_v48  ;;  %v3138_v48 = vld [vmem:[%s4336_s3 + $0x110] sm:$0xff] }
 0x181   :  { %v935_v14 = vor.u32 %v934_v47, %v930_v18 }
 0x182   :  { %v3821_v42 = vld.sshfl [vmem:[#allocation1] sm:$0xff pattern:$0x73625140] }
 0x183   :  { %915 = vst [vmem:[#allocation1] ss:$4 sm:$0xff] %v3732_v45  ;;  %v1159_v33 = vunpack.c.l.b16 %v935_v14  ;;  %v950_v54 = vshll.u32 %v3821_v42, 16  ;;  %v948_v2 = vshrl.u32 %v3821_v42, 16  ;;  %v3132_v14 = vld [vmem:[%s4336_s3 + $0xe0] sm:$0xff] }
 0x184   :  { %916 = vst [vmem:[#allocation1 + $0x1] ss:$4 sm:$0xff] %v3739_v52  ;;  %1647 = vmatpush.bf16.msra.mxu2 %v3132_v14 }
 0x185   :  { %917 = vst [vmem:[#allocation1 + $0x2] ss:$4 sm:$0xff] %v3836_v24  ;;  %v1278_v32 = vpack.c.b16 %v1159_v33, %v1154_v63  ;;  %v952_v30 = vrot.slane %v950_v54, 1  ;;  %v3143_v33 = vld [vmem:[%s4336_s3 + $0x138] sm:$0xff] }
 0x186   :  { %v905_v16 = vld.sshfl [vmem:[#allocation1 + $0x20] sm:$0xff pattern:$0x73625140]  ;;  %1673 = vmatpush.bf16.msrb.mxu1 %v3143_v33 }
 0x187   :  { %910 = vst [vmem:[#allocation1 + $0x20] ss:$4 sm:$0xff] %v3707_v23  ;;  %1594 = vmatmul.bf16.vlgmr.msra.gmra.mxu3 %v1278_v32  ;;  %v944_v21 = vshll.u32 %v905_v16, 16  ;;  %v942_v26 = vshrl.u32 %v905_v16, 16  ;;  %v953_v29 = vor.u32 %v952_v30, %v948_v2  ;;  %v3131_v16 = vld [vmem:[%s4336_s3 + $0xd8] sm:$0xff] }
 0x188   :  { %911 = vst [vmem:[#allocation1 + $0x21] ss:$4 sm:$0xff] %v3717_v12  ;;  %1648 = vmatpush.bf16.msra.mxu2 %v3131_v16 }
 0x189   :  { %913 = vst [vmem:[#allocation1 + $0x22] ss:$4 sm:$0xff] %v3842_v35  ;;  %v946_v22 = vrot.slane %v944_v21, 1  ;;  %v1174_v3 = vunpack.c.l.b16 %v953_v29 }
 0x18b   :  { %v947_v57 = vor.u32 %v946_v22, %v942_v26  ;;  %v3142_v22 = vld [vmem:[%s4336_s3 + $0x130] sm:$0xff] }
 0x18c   :  { %v3850_v40 = vld.sshfl [vmem:[#allocation1] sm:$0xff pattern:$0x73625140]  ;;  %1674 = vmatpush.bf16.msrb.mxu1 %v3142_v22  ;;  %1649 = vmatpush.bf16.msra.mxu2 %v3130_v4 }
 0x18d   :  { %972 = vst [vmem:[#allocation1] ss:$4 sm:$0xff] %v3613_v38  ;;  %v1169_v59 = vunpack.c.l.b16 %v947_v57  ;;  %v962_v19 = vshll.u32 %v3850_v40, 16 }
 0x18e   :  { %974 = vst [vmem:[#allocation1 + $0x1] ss:$4 sm:$0xff] %v3617_v11 }
 0x18f   :  { %976 = vst [vmem:[#allocation1 + $0x2] ss:$4 sm:$0xff] %v3629_v43  ;;  %v1283_v9 = vpack.c.b16 %v1169_v59, %v1164_v61  ;;  %v964_v1 = vrot.slane %v962_v19, 1  ;;  %v960_v59 = vshrl.u32 %v3850_v40, 16 }
 0x190   :  { %v914_v53 = vld.sshfl [vmem:[#allocation1 + $0x20] sm:$0xff pattern:$0x73625140]  ;;  %1675 = vmatpush.bf16.msrb.mxu1 %v3141_v44 }
 0x191   :  { %919 = vst [vmem:[#allocation1 + $0x20] ss:$4 sm:$0xff] %v3757_v46  ;;  %v956_v13 = vshll.u32 %v914_v53, 16  ;;  %v954_v41 = vshrl.u32 %v914_v53, 16  ;;  %v3129_v53 = vld [vmem:[%s4336_s3 + $0xc8] sm:$0xff] }
 0x192   :  { %920 = vst [vmem:[#allocation1 + $0x21] ss:$4 sm:$0xff] %v3773_v60  ;;  %1650 = vmatpush.bf16.msra.mxu2 %v3129_v53 }
 0x193   :  { %922 = vst [vmem:[#allocation1 + $0x22] ss:$4 sm:$0xff] %v3862_v8  ;;  %v958_v15 = vrot.slane %v956_v13, 1  ;;  %v965_v13 = vor.u32 %v964_v1, %v960_v59 }
 0x195   :  { %v959_v17 = vor.u32 %v958_v15, %v954_v41 }
 0x196   :  { %v977_v55 = vld.sshfl [vmem:[#allocation1] sm:$0xff pattern:$0x73625140]  ;;  %1651 = vmatpush.bf16.msra.mxu2 %v3128_v27 }
 0x197   :  { %987 = vst [vmem:[#allocation1] ss:$4 sm:$0xff] %v3652_v39  ;;  %1599 = vmatmul.bf16.gmra.mxu3 %v1283_v9  ;;  %v1179_v47 = vunpack.c.l.b16 %v959_v17  ;;  %v1017_v42 = vrot.slane %v977_v55, 1  ;;  %v3140_v55 = vld [vmem:[%s4336_s3 + $0x120] sm:$0xff] }
 0x198   :  { %988 = vst [vmem:[#allocation1 + $0x1] ss:$4 sm:$0xff] %v3656_v62  ;;  %1676 = vmatpush.bf16.msrb.mxu1 %v3140_v55 }
 0x199   :  { %989 = vst [vmem:[#allocation1 + $0x2] ss:$4 sm:$0xff] %v3661_v37  ;;  %v1288_v32 = vpack.c.b16 %v1179_v47, %v1174_v3  ;;  %v1155_v7 = vunpack.c.l.b16 %v1017_v42 }
 0x19a   :  { %v923_v50 = vld.sshfl [vmem:[#allocation1 + $0x20] sm:$0xff pattern:$0x73625140] }
 0x19b   :  { %980 = vst [vmem:[#allocation1 + $0x20] ss:$4 sm:$0xff] %v3633_v49  ;;  %v968_v34 = vshll.u32 %v923_v50, 16  ;;  %v966_v58 = vshrl.u32 %v923_v50, 16  ;;  %v1184_v50 = vunpack.c.l.b16 %v965_v13 }
 0x19c   :  { %982 = vst [vmem:[#allocation1 + $0x21] ss:$4 sm:$0xff] %v3637_v10  ;;  %1677 = vmatpush.bf16.msrb.mxu1 %v3139_v6 }
 0x19d   :  { %984 = vst [vmem:[#allocation1 + $0x22] ss:$4 sm:$0xff] %v3792_v36  ;;  %v970_v0 = vrot.slane %v968_v34, 1 }
 0x19f   :  { %v971_v61 = vor.u32 %v970_v0, %v966_v58 }
 0x1a0   :  { %v3884_v18 = vld.sshfl [vmem:[#allocation1] sm:$0xff pattern:$0x73625140]  ;;  %1678 = vmatpush.bf16.msrb.mxu1 %v3138_v48 }
 0x1a1   :  { %997 = vst [vmem:[#allocation1] ss:$4 sm:$0xff] %v3684_v51  ;;  %v1189_v54 = vunpack.c.l.b16 %v971_v61  ;;  %v1019_v15 = vrot.slane %v3884_v18, 1 }
 0x1a2   :  { %998 = vst [vmem:[#allocation1 + $0x1] ss:$4 sm:$0xff] %v3688_v20 }
 0x1a3   :  { %999 = vst [vmem:[#allocation1 + $0x2] ss:$4 sm:$0xff] %v3805_v31  ;;  %v1293_v2 = vpack.c.b16 %v1189_v54, %v1184_v50  ;;  %v1165_v17 = vunpack.c.l.b16 %v1019_v15 }
 0x1a4   :  { %v985_v63 = vld.sshfl [vmem:[#allocation1 + $0x20] sm:$0xff pattern:$0x73625140] }
 0x1a5   :  { %992 = vst [vmem:[#allocation1 + $0x20] ss:$4 sm:$0xff] %v3665_v28  ;;  %v1018_v5 = vrot.slane %v985_v63, 1 }
 0x1a6   :  { %993 = vst [vmem:[#allocation1 + $0x21] ss:$4 sm:$0xff] %v3676_v56 }
 0x1a7   :  { %994 = vst [vmem:[#allocation1 + $0x22] ss:$4 sm:$0xff] %v3813_v25  ;;  %v1160_v21 = vunpack.c.l.b16 %v1018_v5  ;;  %1604 = vmatmul.bf16.gmra.mxu3 %v1288_v32 }
 0x1a9   :  { %v1279_v26 = vpack.c.b16 %v1160_v21, %v1155_v7 }
 0x1aa   :  { %v1000_v57 = vld.sshfl [vmem:[#allocation1] sm:$0xff pattern:$0x73625140] }
 0x1ab   :  { %1007 = vst [vmem:[#allocation1] ss:$4 sm:$0xff] %v3732_v45  ;;  %1623 = vmatmul.bf16.vlgmr.msra.gmra.mxu0 %v1279_v26  ;;  %v1021_v3 = vrot.slane %v1000_v57, 1 }
 0x1ac   :  { %1008 = vst [vmem:[#allocation1 + $0x1] ss:$4 sm:$0xff] %v3739_v52 }
 0x1ad   :  { %1009 = vst [vmem:[#allocation1 + $0x2] ss:$4 sm:$0xff] %v3836_v24  ;;  %v1175_v33 = vunpack.c.l.b16 %v1021_v3 }
 0x1ae   :  { %v995_v9 = vld.sshfl [vmem:[#allocation1 + $0x20] sm:$0xff pattern:$0x73625140] }
 0x1af   :  { %1002 = vst [vmem:[#allocation1 + $0x20] ss:$4 sm:$0xff] %v3707_v23  ;;  %v1020_v40 = vrot.slane %v995_v9, 1 }
 0x1b0   :  { %1003 = vst [vmem:[#allocation1 + $0x21] ss:$4 sm:$0xff] %v3717_v12 }
 0x1b1   :  { %1004 = vst [vmem:[#allocation1 + $0x22] ss:$4 sm:$0xff] %v3842_v35  ;;  %v1170_v41 = vunpack.c.l.b16 %v1020_v40 }
 0x1b3   :  { %v1284_v18 = vpack.c.b16 %v1170_v41, %v1165_v17 }
 0x1b4   :  { %v3931_v30 = vld.sshfl [vmem:[#allocation1] sm:$0xff pattern:$0x73625140] }
 0x1b5   :  { %1029 = vst [vmem:[#allocation1 + $0x2] ss:$4 sm:$0xff] %v3629_v43  ;;  %v1023_v44 = vrot.slane %v3931_v30, 1 }
 0x1b6   :  { %1025 = vst [vmem:[#allocation1] ss:$4 sm:$0xff] %v3613_v38  ;;  %v3137_v38 = vld [vmem:[%s4336_s3 + $0x108] sm:$0xff] }
 0x1b7   :  { %1027 = vst [vmem:[#allocation1 + $0x1] ss:$4 sm:$0xff] %v3617_v11  ;;  %1609 = vmatmul.bf16.gmra.mxu3 %v1293_v2  ;;  %1679 = vmatpush.bf16.msrb.mxu1 %v3137_v38  ;;  %v1185_v61 = vunpack.c.l.b16 %v1023_v44 }
 0x1b8   :  { %v1005_v29 = vld.sshfl [vmem:[#allocation1 + $0x20] sm:$0xff pattern:$0x73625140] }
 0x1b9   :  { %1012 = vst [vmem:[#allocation1 + $0x20] ss:$4 sm:$0xff] %v3757_v46  ;;  %v1022_v14 = vrot.slane %v1005_v29, 1 }
 0x1ba   :  { %1013 = vst [vmem:[#allocation1 + $0x21] ss:$4 sm:$0xff] %v3773_v60 }
 0x1bb   :  { %1014 = vst [vmem:[#allocation1 + $0x22] ss:$4 sm:$0xff] %v3862_v8  ;;  %1628 = vmatmul.bf16.gmra.mxu0 %v1284_v18  ;;  %v1180_v63 = vunpack.c.l.b16 %v1022_v14 }
 0x1bd   :  { %v1289_v34 = vpack.c.b16 %v1180_v63, %v1175_v33 }
 0x1be   :  { %v1030_v47 = vld.sshfl [vmem:[#allocation1] sm:$0xff pattern:$0x73625140] }
 0x1bf   :  { %1038 = vst [vmem:[#allocation1] ss:$4 sm:$0xff] %v3652_v39  ;;  %v1062_v5 = vshrl.u32 %v1030_v47, 16  ;;  %v1065_v32 = vshll.u32 %v1030_v47, 16  ;;  %v3136_v39 = vld [vmem:[%s4336_s3 + $0x100] sm:$0xff] }
 0x1c0   :  { %1039 = vst [vmem:[#allocation1 + $0x1] ss:$4 sm:$0xff] %v3656_v62  ;;  %1680 = vmatpush.bf16.msrb.mxu1 %v3136_v39 }
 0x1c1   :  { %1040 = vst [vmem:[#allocation1 + $0x2] ss:$4 sm:$0xff] %v3661_v37  ;;  %v1064_v7 = vrot.slane %v1062_v5, 1 }
 0x1c2   :  { %v1015_v42 = vld.sshfl [vmem:[#allocation1 + $0x20] sm:$0xff pattern:$0x73625140] }
 0x1c3   :  { %1034 = vst [vmem:[#allocation1 + $0x21] ss:$4 sm:$0xff] %v3637_v10  ;;  %v1024_v57 = vrot.slane %v1015_v42, 1 }
 0x1c4   :  { %1032 = vst [vmem:[#allocation1 + $0x20] ss:$4 sm:$0xff] %v3633_v49  ;;  %v1067_v49 = vrot.slane %v1065_v32, 2 }
 0x1c5   :  { %1036 = vst [vmem:[#allocation1 + $0x22] ss:$4 sm:$0xff] %v3792_v36 }
 0x1c6   :  { %v1068_v4 = vor.u32 %v1067_v49, %v1064_v7 }
 0x1c8   :  { %v1041_v16 = vld.sshfl [vmem:[#allocation1] sm:$0xff pattern:$0x73625140]  ;;  %v1156_v58 = vunpack.c.l.b16 %v1068_v4 }
 0x1c9   :  { %1046 = vst [vmem:[#allocation1] ss:$4 sm:$0xff] %v3684_v51  ;;  %v1076_v13 = vshrl.u32 %v1041_v16, 16  ;;  %v1079_v55 = vshll.u32 %v1041_v16, 16 }
 0x1ca   :  { %1047 = vst [vmem:[#allocation1 + $0x1] ss:$4 sm:$0xff] %v3688_v20 }
 0x1cb   :  { %1633 = vmatmul.bf16.gmra.mxu0 %v1289_v34  ;;  %1048 = vst [vmem:[#allocation1 + $0x2] ss:$4 sm:$0xff] %v3805_v31  ;;  %v1078_v50 = vrot.slane %v1076_v13, 1  ;;  %v1081_v6 = vrot.slane %v1079_v55, 2  ;;  %v1566_v55 = vpop.f32.mrf.mxu1 }
 0x1cc   :  { %v1037_v21 = vld.sshfl [vmem:[#allocation1 + $0x20] sm:$0xff pattern:$0x73625140] }
 0x1cd   :  { %v1069_v22 = vshrl.u32 %v1037_v21, 16  ;;  %v1072_v19 = vshll.u32 %v1037_v21, 16  ;;  %1042 = vst [vmem:[#allocation1 + $0x20] ss:$4 sm:$0xff] %v3665_v28  ;;  %v1190_v28 = vunpack.c.l.b16 %v1024_v57 }
 0x1ce   :  { %1043 = vst [vmem:[#allocation1 + $0x21] ss:$4 sm:$0xff] %v3676_v56 }
 0x1cf   :  { %v1071_v26 = vrot.slane %v1069_v22, 1  ;;  %v1074_v0 = vrot.slane %v1072_v19, 2  ;;  %1044 = vst [vmem:[#allocation1 + $0x22] ss:$4 sm:$0xff] %v3813_v25  ;;  %v1294_v54 = vpack.c.b16 %v1190_v28, %v1185_v61 }
 0x1d1   :  { %v1075_v51 = vor.u32 %v1074_v0, %v1071_v26 }
 0x1d2   :  { %v1049_v1 = vld.sshfl [vmem:[#allocation1] sm:$0xff pattern:$0x73625140] }
 0x1d3   :  { %v1161_v53 = vunpack.c.l.b16 %v1075_v51  ;;  %1054 = vst [vmem:[#allocation1] ss:$4 sm:$0xff] %v3732_v45 }
 0x1d4   :  { %1055 = vst [vmem:[#allocation1 + $0x1] ss:$4 sm:$0xff] %v3739_v52 }
 0x1d5   :  { %v1280_v59 = vpack.c.b16 %v1161_v53, %v1156_v58  ;;  %1056 = vst [vmem:[#allocation1 + $0x2] ss:$4 sm:$0xff] %v3836_v24 }
 0x1d6   :  { %v1045_v9 = vld.sshfl [vmem:[#allocation1 + $0x20] sm:$0xff pattern:$0x73625140] }
 0x1d7   :  { %1652 = vmatmul.bf16.vlgmr.msra.gmra.mxu2 %v1280_v59  ;;  %1050 = vst [vmem:[#allocation1 + $0x20] ss:$4 sm:$0xff] %v3707_v23  ;;  %v1083_v27 = vshrl.u32 %v1045_v9, 16  ;;  %v1086_v40 = vshll.u32 %v1045_v9, 16  ;;  %v1082_v23 = vor.u32 %v1081_v6, %v1078_v50 }
 0x1d8   :  { %1051 = vst [vmem:[#allocation1 + $0x21] ss:$4 sm:$0xff] %v3717_v12 }
 0x1d9   :  { %v1085_v15 = vrot.slane %v1083_v27, 1  ;;  %v1088_v45 = vrot.slane %v1086_v40, 2  ;;  %1052 = vst [vmem:[#allocation1 + $0x22] ss:$4 sm:$0xff] %v3842_v35  ;;  %v1166_v48 = vunpack.c.l.b16 %v1082_v23  ;;  %v1568_v27 = vpop.f32.mrf.mxu1 }
 0x1db   :  { %1638 = vmatmul.bf16.gmra.mxu0 %v1294_v54  ;;  %v1089_v41 = vor.u32 %v1088_v45, %v1085_v15 }
 0x1dc   :  { %v1057_v30 = vld.sshfl [vmem:[#allocation1] sm:$0xff pattern:$0x73625140] }
 0x1dd   :  { %1118 = vst [vmem:[#allocation1] ss:$4 sm:$0xff] %v3617_v11  ;;  %v1171_v17 = vunpack.c.l.b16 %v1089_v41  ;;  %v1090_v11 = vshrl.u32 %v1049_v1, 16  ;;  %v1104_v21 = vshrl.u32 %v1057_v30, 16  ;;  %v1107_v22 = vshll.u32 %v1057_v30, 16 }
 0x1de   :  { %1120 = vst [vmem:[#allocation1 + $0x1] ss:$4 sm:$0xff] %v3629_v43  ;;  %v1093_v43 = vshll.u32 %v1049_v1, 16 }
 0x1df   :  { %v1285_v29 = vpack.c.b16 %v1171_v17, %v1166_v48  ;;  %v1106_v4 = vrot.slane %v1104_v21, 1  ;;  %v1109_v26 = vrot.slane %v1107_v22, 2 }
 0x1e0   :  { %v1053_v2 = vld.sshfl [vmem:[#allocation1 + $0x20] sm:$0xff pattern:$0x73625140]  ;;  %v1095_v63 = vrot.slane %v1093_v43, 2 }
 0x1e1   :  { %1058 = vst [vmem:[#allocation1 + $0x20] ss:$4 sm:$0xff] %v3757_v46  ;;  %v1097_v38 = vshrl.u32 %v1053_v2, 16  ;;  %v1100_v47 = vshll.u32 %v1053_v2, 16  ;;  %v1092_v46 = vrot.slane %v1090_v11, 1  ;;  %v1110_v0 = vor.u32 %v1109_v26, %v1106_v4  ;;  %v1571_v40 = vpop.f32.mrf.mxu1 }
 0x1e2   :  { %1059 = vst [vmem:[#allocation1 + $0x21] ss:$4 sm:$0xff] %v3773_v60 }
 0x1e3   :  { %1060 = vst [vmem:[#allocation1 + $0x22] ss:$4 sm:$0xff] %v3862_v8  ;;  %v1099_v14 = vrot.slane %v1097_v38, 1  ;;  %v1102_v42 = vrot.slane %v1100_v47, 2  ;;  %v1096_v32 = vor.u32 %v1095_v63, %v1092_v46  ;;  %v1186_v44 = vunpack.c.l.b16 %v1110_v0 }
 0x1e5   :  { %v1121_v18 = vld.sshfl [vmem:[#allocation1] sm:$0xff pattern:$0x73625140]  ;;  %v1103_v33 = vor.u32 %v1102_v42, %v1099_v14  ;;  %v1176_v39 = vunpack.c.l.b16 %v1096_v32 }
 0x1e6   :  { %1129 = vst [vmem:[#allocation1] ss:$4 sm:$0xff] %v3656_v62  ;;  %v1157_v16 = vunpack.c.l.b16 %v1121_v18  ;;  %v3204_v32 = vld [vmem:[%s4337_s4] ss:$0 sm:$0xff] }
 0x1e7   :  { %1657 = vmatmul.bf16.gmra.mxu2 %v1285_v29  ;;  %1130 = vst [vmem:[#allocation1 + $0x1] ss:$4 sm:$0xff] %v3661_v37  ;;  %v1181_v62 = vunpack.c.l.b16 %v1103_v33  ;;  %v1567_v4 = vadd.f32 %v3204_v32, %v1566_v55 }
 0x1e9   :  { %v1573_v54 = vpop.f32.mrf.mxu1 }
 0x1ea   :  { %v1061_v3 = vld.sshfl [vmem:[#allocation1 + $0x20] sm:$0xff pattern:$0x73625140] }
 0x1eb   :  { %1124 = vst [vmem:[#allocation1 + $0x20] ss:$4 sm:$0xff] %v3637_v10  ;;  %v1290_v10 = vpack.c.b16 %v1181_v62, %v1176_v39  ;;  %v1111_v7 = vshrl.u32 %v1061_v3, 16  ;;  %v1114_v49 = vshll.u32 %v1061_v3, 16  ;;  %v1569_v39 = vadd.f32 %v3204_v32, %v1568_v27 }
 0x1ec   :  { %1126 = vst [vmem:[#allocation1 + $0x21] ss:$4 sm:$0xff] %v3792_v36 }
 0x1ee   :  { %v1131_v5 = vld.sshfl [vmem:[#allocation1] sm:$0xff pattern:$0x73625140] }
 0x1ef   :  { %1137 = vst [vmem:[#allocation1] ss:$4 sm:$0xff] %v3688_v20  ;;  %v1113_v20 = vrot.slane %v1111_v7, 1  ;;  %v1167_v1 = vunpack.c.l.b16 %v1131_v5 }
 0x1f0   :  { %1138 = vst [vmem:[#allocation1 + $0x1] ss:$4 sm:$0xff] %v3805_v31  ;;  %v1116_v31 = vrot.slane %v1114_v49, 2 }
 0x1f1   :  { %v1576_v15 = vpop.f32.mrf.mxu1 }
 0x1f2   :  { %v1577_v7 = vadd.f32 %v3204_v32, %v1576_v15 }
 0x1f3   :  { %v1127_v37 = vld.sshfl [vmem:[#allocation1 + $0x20] sm:$0xff pattern:$0x73625140] }
 0x1f4   :  { %v1162_v34 = vunpack.c.l.b16 %v1127_v37  ;;  %1133 = vst [vmem:[#allocation1 + $0x20] ss:$4 sm:$0xff] %v3676_v56 }
 0x1f5   :  { %1134 = vst [vmem:[#allocation1 + $0x21] ss:$4 sm:$0xff] %v3813_v25  ;;  %v1117_v25 = vor.u32 %v1116_v31, %v1113_v20 }
 0x1f6   :  { %v1281_v36 = vpack.c.b16 %v1162_v34, %v1157_v16  ;;  %v1572_v16 = vadd.f32 %v3204_v32, %v1571_v40  ;;  %v1574_v34 = vadd.f32 %v3204_v32, %v1573_v54 }
 0x1f7   :  { %1662 = vmatmul.bf16.gmra.mxu2 %v1290_v10  ;;  %v1139_v19 = vld.sshfl [vmem:[#allocation1] sm:$0xff pattern:$0x73625140]  ;;  %v1191_v51 = vunpack.c.l.b16 %v1117_v25 }
 0x1f8   :  { %1681 = vmatmul.bf16.vlgmr.msrb.gmra.mxu1 %v1281_v36  ;;  %1145 = vst [vmem:[#allocation1] ss:$4 sm:$0xff] %v3739_v52  ;;  %v1177_v59 = vunpack.c.l.b16 %v1139_v19 }
 0x1f9   :  { %1146 = vst [vmem:[#allocation1 + $0x1] ss:$4 sm:$0xff] %v3836_v24  ;;  %v1295_v58 = vpack.c.b16 %v1191_v51, %v1186_v44 }
 0x1fc   :  { %v1135_v56 = vld.sshfl [vmem:[#allocation1 + $0x20] sm:$0xff pattern:$0x73625140] }
 0x1fd   :  { %1141 = vst [vmem:[#allocation1 + $0x20] ss:$4 sm:$0xff] %v3717_v12  ;;  %v1172_v57 = vunpack.c.l.b16 %v1135_v56 }
 0x1fe   :  { %1142 = vst [vmem:[#allocation1 + $0x21] ss:$4 sm:$0xff] %v3842_v35 }
 0x1ff   :  { %v1286_v52 = vpack.c.b16 %v1172_v57, %v1167_v1 }
 0x200   :  { %v1147_v35 = vld.sshfl [vmem:[#allocation1] sm:$0xff pattern:$0x73625140] }
 0x201   :  { %v1187_v9 = vunpack.c.l.b16 %v1147_v35 }
 0x205   :  { %v1143_v53 = vld.sshfl [vmem:[#allocation1 + $0x20] sm:$0xff pattern:$0x73625140] }
 0x206   :  { %1149 = vst [vmem:[#allocation1 + $0x20] ss:$4 sm:$0xff] %v3773_v60  ;;  %v1182_v24 = vunpack.c.l.b16 %v1143_v53  ;;  %v1578_v60 = vpop.f32.mrf.mxu1 }
 0x207   :  { %1667 = vmatmul.bf16.gmra.mxu2 %v1295_v58  ;;  %1150 = vst [vmem:[#allocation1 + $0x21] ss:$4 sm:$0xff] %v3862_v8  ;;  %v1579_v36 = vadd.f32 %v3204_v32, %v1578_v60 }
 0x208   :  { %1686 = vmatmul.bf16.gmra.mxu1 %v1286_v52  ;;  %v1291_v12 = vpack.c.b16 %v1182_v24, %v1177_v59 }
 0x20a   :  { %v1595_v45 = vpop.f32.mrf.mxu3 }
 0x20b   :  { %v1596_v58 = vadd.f32 %v1595_v45, %v1567_v4  ;;  %v3151_v45 = vld [vmem:[%s4338_s5 + $0x38] sm:$0xff] }
 0x20c   :  { %2265 = vmatpush.bf16.msrb.mxu3 %v3151_v45 }
 0x20e   :  { %v1151_v28 = vld.sshfl [vmem:[#allocation1 + $0x20] sm:$0xff pattern:$0x73625140]  ;;  %v1581_v8 = vpop.f32.mrf.mxu1 }
 0x20f   :  { %v1192_v61 = vunpack.c.l.b16 %v1151_v28  ;;  %v1582_v0 = vadd.f32 %v3204_v32, %v1581_v8  ;;  %v3167_v8 = vld [vmem:[%s4338_s5 + $0xb8] sm:$0xff] }
 0x210   :  { %2291 = vmatpush.bf16.msrb.mxu2 %v3167_v8 }
 0x211   :  { %v1296_v13 = vpack.c.b16 %v1192_v61, %v1187_v9 }
 0x212   :  { %v1597_v30 = vpop.f32.mrf.mxu3 }
 0x213   :  { %v1598_v10 = vadd.f32 %v1597_v30, %v1569_v39 }
 0x216   :  { %v3986_v23 = vpop.f32.mrf.mxu1 }
 0x218   :  { %1691 = vmatmul.bf16.gmra.mxu1 %v1291_v12 }
 0x21a   :  { %v1600_v17 = vpop.f32.mrf.mxu3 }
 0x21b   :  { %v1601_v49 = vadd.f32 %v1600_v17, %v1572_v16 }
 0x222   :  { %v1602_v38 = vpop.f32.mrf.mxu3 }
 0x223   :  { %v1603_v21 = vadd.f32 %v1602_v38, %v1574_v34  ;;  %v3166_v38 = vld [vmem:[%s4338_s5 + $0xb0] sm:$0xff] }
 0x224   :  { %2292 = vmatpush.bf16.msrb.mxu2 %v3166_v38 }
 0x228   :  { %1696 = vmatmul.bf16.gmra.mxu1 %v1296_v13  ;;  %v1624_v50 = vpop.f32.mrf.mxu0 }
 0x229   :  { %v1625_v35 = vadd.f32 %v1624_v50, %v1596_v58 }
 0x22a   :  { %v1605_v42 = vpop.f32.mrf.mxu3 }
 0x22b   :  { %v1606_v19 = vadd.f32 %v1605_v42, %v1577_v7 }
 0x230   :  { %v1626_v41 = vpop.f32.mrf.mxu0 }
 0x231   :  { %v1627_v22 = vadd.f32 %v1626_v41, %v1598_v10 }
 0x232   :  { %v1607_v33 = vpop.f32.mrf.mxu3 }
 0x233   :  { %v1608_v26 = vadd.f32 %v1607_v33, %v1579_v36 }
 0x238   :  { %v1629_v48 = vpop.f32.mrf.mxu0 }
 0x239   :  { %v1630_v20 = vadd.f32 %v1629_v48, %v1601_v49 }
 0x23a   :  { %v1610_v31 = vpop.f32.mrf.mxu3 }
 0x23b   :  { %v1611_v61 = vadd.f32 %v1610_v31, %v1582_v0 }
 0x240   :  { %v1631_v11 = vpop.f32.mrf.mxu0 }
 0x241   :  { %v1632_v56 = vadd.f32 %v1631_v11, %v1603_v21 }
 0x248   :  { %v1634_v3 = vpop.f32.mrf.mxu0 }
 0x249   :  { %v1635_v51 = vadd.f32 %v1634_v3, %v1606_v19 }
 0x250   :  { %v1636_v5 = vpop.f32.mrf.mxu0 }
 0x251   :  { %v1637_v53 = vadd.f32 %v1636_v5, %v1608_v26 }
 0x258   :  { %v1639_v57 = vpop.f32.mrf.mxu0 }
 0x259   :  { %v1640_v40 = vadd.f32 %v1639_v57, %v1611_v61 }
 0x25a   :  { %v1653_v6 = vpop.f32.mrf.mxu2 }
 0x25b   :  { %v1654_v27 = vadd.f32 %v1653_v6, %v1625_v35  ;;  %v1612_v6 = vpop.f32.mrf.mxu3 }
 0x262   :  { %v1655_v2 = vpop.f32.mrf.mxu2 }
 0x263   :  { %v1656_v25 = vadd.f32 %v1655_v2, %v1627_v22  ;;  %v3159_v2 = vld [vmem:[%s4338_s5 + $0x78] sm:$0xff]  ;;  %v3148_v22 = vld [vmem:[%s4338_s5 + $0x20] sm:$0xff] }
 0x264   :  { %2278 = vmatpush.bf16.msrb.mxu0 %v3159_v2 }
 0x26a   :  { %v1658_v18 = vpop.f32.mrf.mxu2 }
 0x26b   :  { %v1659_v44 = vadd.f32 %v1658_v18, %v1630_v20  ;;  %v3150_v18 = vld [vmem:[%s4338_s5 + $0x30] sm:$0xff] }
 0x26c   :  { %2266 = vmatpush.bf16.msrb.mxu3 %v3150_v18 }
 0x272   :  { %v1660_v43 = vpop.f32.mrf.mxu2 }
 0x273   :  { %v1661_v52 = vadd.f32 %v1660_v43, %v1632_v56 }
 0x275   :  { %v1682_v29 = vpop.f32.mrf.mxu1 }
 0x276   :  { %v1683_v30 = vadd.f32 %v1682_v29, %v1654_v27  ;;  %v1584_v29 = vadd.f32 %v3204_v32, %v3986_v23 }
 0x278   :  { %v1613_v3 = vadd.f32 %v1612_v6, %v1584_v29 }
 0x27a   :  { %v1663_v46 = vpop.f32.mrf.mxu2 }
 0x27b   :  { %v1664_v59 = vadd.f32 %v1663_v46, %v1635_v51  ;;  %v1702_v46 = vmax.f32 %v1683_v30, 0.0 }
 0x27d   :  { %v1684_v47 = vpop.f32.mrf.mxu1  ;;  %v1718_v10 = vrot.slane %v1702_v46, 1 }
 0x27e   :  { %v1685_v24 = vadd.f32 %v1684_v47, %v1656_v25 }
 0x27f   :  { %v4027_v56 = vmax.f32 %v1702_v46, %v1718_v10  ;;  %v3156_v46 = vld [vmem:[%s4338_s5 + $0x60] sm:$0xff]  ;;  %v3173_v10 = vld [vmem:[%s4338_s5 + $0xe8] sm:$0xff] }
 0x280   :  { %v1703_v54 = vmax.f32 %v1685_v24, 0.0 }
 0x282   :  { %v1665_v62 = vpop.f32.mrf.mxu2  ;;  %v1719_v47 = vrot.slane %v1703_v54, 1 }
 0x283   :  { %v1666_v9 = vadd.f32 %v1665_v62, %v1637_v53 }
 0x284   :  { %v4010_v23 = vmax.f32 %v1703_v54, %v1719_v47  ;;  %v3158_v47 = vld [vmem:[%s4338_s5 + $0x70] sm:$0xff] }
 0x285   :  { %v1687_v14 = vpop.f32.mrf.mxu1  ;;  %2279 = vmatpush.bf16.msrb.mxu0 %v3158_v47  ;;  %v3168_v47 = vld [vmem:[%s4338_s5 + $0xc0] sm:$0xff] }
 0x286   :  { %v1688_v12 = vadd.f32 %v1687_v14, %v1659_v44  ;;  %v1641_v14 = vpop.f32.mrf.mxu0  ;;  %v1750_v19 = vrot.slane %v4010_v23, 7 }
 0x287   :  { %v1642_v39 = vadd.f32 %v1641_v14, %v1613_v3  ;;  %v3157_v14 = vld [vmem:[%s4338_s5 + $0x68] sm:$0xff]  ;;  %v3146_v3 = vld [vmem:[%s4338_s5 + $0x10] sm:$0xff] }
 0x288   :  { %v1704_v60 = vmax.f32 %v1688_v12, 0.0  ;;  %v1752_v44 = vsel %vm1751_vm3, %v1750_v19, %v4027_v56 }
 0x289   :  { %2280 = vmatpush.bf16.msrb.mxu0 %v3157_v14 }
 0x28a   :  { %v1668_v28 = vpop.f32.mrf.mxu2  ;;  %v1720_v42 = vrot.slane %v1704_v60, 1 }
 0x28b   :  { %v1669_v50 = vadd.f32 %v1668_v28, %v1640_v40 }
 0x28c   :  { %v4012_v16 = vmax.f32 %v1704_v60, %v1720_v42  ;;  %v3164_v42 = vld [vmem:[%s4338_s5 + $0xa0] sm:$0xff] }
 0x28d   :  { %v1689_v63 = vpop.f32.mrf.mxu1  ;;  %2281 = vmatpush.bf16.msrb.mxu0 %v3156_v46 }
 0x28e   :  { %v1690_v13 = vadd.f32 %v1689_v63, %v1661_v52  ;;  %v1753_v4 = vrot.slane %v4012_v16, 6 }
 0x290   :  { %v1705_v41 = vmax.f32 %v1690_v13, 0.0  ;;  %v1755_v53 = vsel %vm1754_vm4, %v1753_v4, %v1752_v44 }
 0x292   :  { %v1721_v63 = vrot.slane %v1705_v41, 1  ;;  %v1670_v62 = vpop.f32.mrf.mxu2 }
 0x293   :  { %v1671_v49 = vadd.f32 %v1670_v62, %v1642_v39  ;;  %v3175_v62 = vld [vmem:[%s4338_s5 + $0xf8] sm:$0xff]  ;;  %v3174_v39 = vld [vmem:[%s4338_s5 + $0xf0] sm:$0xff] }
 0x294   :  { %v4014_v7 = vmax.f32 %v1705_v41, %v1721_v63  ;;  %v3163_v63 = vld [vmem:[%s4338_s5 + $0x98] sm:$0xff] }
 0x295   :  { %v1692_v37 = vpop.f32.mrf.mxu1 }
 0x296   :  { %v1693_v55 = vadd.f32 %v1692_v37, %v1664_v59  ;;  %v3149_v37 = vld [vmem:[%s4338_s5 + $0x28] sm:$0xff]  ;;  %v1756_v25 = vrot.slane %v4014_v7, 5  ;;  %v1798_v59 = vsel %vm1757_vm5, %v1750_v19, %v4027_v56 }
 0x297   :  { %2267 = vmatpush.bf16.msrb.mxu3 %v3149_v37  ;;  %v1799_v35 = vsel %vm1760_vm6, %v1753_v4, %v1798_v59  ;;  %v3155_v37 = vld [vmem:[%s4338_s5 + $0x58] sm:$0xff] }
 0x298   :  { %v1706_v17 = vmax.f32 %v1693_v55, 0.0  ;;  %v1758_v24 = vsel %vm1757_vm5, %v1756_v25, %v1755_v53  ;;  %v1873_v12 = vsel %vm1751_vm3, %v1756_v25, %v1753_v4  ;;  %v1800_v55 = vsel %vm1763_vm7, %v1756_v25, %v1799_v35  ;;  %2282 = vmatpush.bf16.msrb.mxu0 %v3155_v37  ;;  %v3170_v53 = vld [vmem:[%s4338_s5 + $0xd0] sm:$0xff] }
 0x29a   :  { %v1722_v5 = vrot.slane %v1706_v17, 1 }
 0x29b   :  { %2268 = vmatpush.bf16.msrb.mxu3 %v3148_v22  ;;  %v3161_v22 = vld [vmem:[%s4338_s5 + $0x88] sm:$0xff] }
 0x29c   :  { %v4016_v36 = vmax.f32 %v1706_v17, %v1722_v5  ;;  %v1872_v17 = vsel %vm1769_vm9, %v1750_v19, %v4027_v56  ;;  %v3144_v5 = vld [vmem:[%s4338_s5] sm:$0xff] }
 0x29d   :  { %v1694_v1 = vpop.f32.mrf.mxu1 }
 0x29e   :  { %v1695_v15 = vadd.f32 %v1694_v1, %v1666_v9  ;;  %v1759_v51 = vrot.slane %v4016_v36, 4 }
 0x2a0   :  { %v1707_v11 = vmax.f32 %v1695_v15, 0.0  ;;  %v1761_v28 = vsel %vm1760_vm6, %v1759_v51, %v1758_v24  ;;  %v1874_v61 = vsel %vm1754_vm4, %v1759_v51, %v1873_v12  ;;  %v1801_v54 = vsel %vm1766_vm8, %v1759_v51, %v1800_v55  ;;  %v3160_v24 = vld [vmem:[%s4338_s5 + $0x80] sm:$0xff]  ;;  %v3169_v55 = vld [vmem:[%s4338_s5 + $0xc8] sm:$0xff] }
 0x2a2   :  { %v1723_v32 = vrot.slane %v1707_v11, 1 }
 0x2a4   :  { %v4022_v20 = vmax.f32 %v1707_v11, %v1723_v32  ;;  %v3165_v11 = vld [vmem:[%s4338_s5 + $0xa8] sm:$0xff]  ;;  %v3162_v32 = vld [vmem:[%s4338_s5 + $0x90] sm:$0xff] }
 0x2a5   :  { %v1697_v48 = vpop.f32.mrf.mxu1  ;;  %2293 = vmatpush.bf16.msrb.mxu2 %v3165_v11 }
 0x2a6   :  { %v1698_v43 = vadd.f32 %v1697_v48, %v1669_v50  ;;  %v1762_v1 = vrot.slane %v4022_v20, 3  ;;  %v1835_v50 = vsel %vm1763_vm7, %v1750_v19, %v4027_v56 }
 0x2a7   :  { %v1836_v2 = vsel %vm1766_vm8, %v1753_v4, %v1835_v50  ;;  %v3171_v4 = vld [vmem:[%s4338_s5 + $0xd8] sm:$0xff] }
 0x2a8   :  { %v1708_v33 = vmax.f32 %v1698_v43, 0.0  ;;  %v1764_v13 = vsel %vm1763_vm7, %v1762_v1, %v1761_v28  ;;  %v1875_v27 = vsel %vm1757_vm5, %v1762_v1, %v1874_v61  ;;  %v1802_v8 = vsel %vm1769_vm9, %v1762_v1, %v1801_v54  ;;  %v3147_v43 = vld [vmem:[%s4338_s5 + $0x18] sm:$0xff] }
 0x2a9   :  { %v1837_v6 = vsel %vm1769_vm9, %v1756_v25, %v1836_v2  ;;  %v1838_v18 = vsel %vm1751_vm3, %v1762_v1, %v1759_v51  ;;  %2269 = vmatpush.bf16.msrb.mxu3 %v3147_v43  ;;  %2294 = vmatpush.bf16.msrb.mxu2 %v3164_v42 }
 0x2aa   :  { %v1724_v34 = vrot.slane %v1708_v33, 1  ;;  %v3193_v48 = vpack.i.bf16 %v1872_v17, %v1837_v6 }
 0x2ac   :  { %v4025_v26 = vmax.f32 %v1708_v33, %v1724_v34  ;;  %v3145_v33 = vld [vmem:[%s4338_s5 + $0x8] sm:$0xff]  ;;  %v3154_v34 = vld [vmem:[%s4338_s5 + $0x50] sm:$0xff] }
 0x2ad   :  { %v1699_v21 = vpop.f32.mrf.mxu1  ;;  %2270 = vmatpush.bf16.msrb.mxu3 %v3146_v3  ;;  %2295 = vmatpush.bf16.msrb.mxu2 %v3163_v63 }
 0x2ae   :  { %v1700_v31 = vadd.f32 %v1699_v21, %v1671_v49  ;;  %v1765_v58 = vrot.slane %v4025_v26, 2  ;;  %2283 = vmatpush.bf16.msrb.mxu0 %v3154_v34  ;;  %v3153_v49 = vld [vmem:[%s4338_s5 + $0x48] sm:$0xff]  ;;  %v3172_v21 = vld [vmem:[%s4338_s5 + $0xe0] sm:$0xff] }
 0x2b0   :  { %v1709_v0 = vmax.f32 %v1700_v31, 0.0  ;;  %v1767_v40 = vsel %vm1766_vm8, %v1765_v58, %v1764_v13  ;;  %v1876_v15 = vsel %vm1760_vm6, %v1765_v58, %v1875_v27  ;;  %v1839_v38 = vsel %vm1754_vm4, %v1765_v58, %v1838_v18  ;;  %v3152_v31 = vld [vmem:[%s4338_s5 + $0x40] sm:$0xff] }
 0x2b1   :  { %2271 = vmatpush.bf16.msrb.mxu3 %v3145_v33  ;;  %2296 = vmatpush.bf16.msrb.mxu2 %v3162_v32 }
 0x2b2   :  { %v1725_v57 = vrot.slane %v1709_v0, 1  ;;  %2284 = vmatpush.bf16.msrb.mxu0 %v3153_v49 }
 0x2b4   :  { %v4036_v52 = vmax.f32 %v1709_v0, %v1725_v57 }
 0x2b5   :  { %2272 = vmatpush.bf16.msrb.mxu3 %v3144_v5  ;;  %2297 = vmatpush.bf16.msrb.mxu2 %v3161_v22 }
 0x2b6   :  { %v1768_v9 = vrot.slane %v4036_v52, 1  ;;  %2285 = vmatpush.bf16.msrb.mxu0 %v3152_v31 }
 0x2b8   :  { %v1803_v60 = vsel %vm1751_vm3, %v1768_v9, %v1765_v58  ;;  %v1770_v45 = vsel %vm1769_vm9, %v1768_v9, %v1767_v40  ;;  %v1877_v30 = vsel %vm1763_vm7, %v1768_v9, %v1876_v15  ;;  %v1840_v29 = vsel %vm1757_vm5, %v1768_v9, %v1839_v38 }
 0x2b9   :  { %1806 = vrot.lane.b32.xlu2 %v1803_v60, %s3208_s18  ;;  %1771 = vrot.lane.b32.xlu0 %v1770_v45, %s3208_s18  ;;  %v3198_v41 = vpack.i.bf16 %v1802_v8, %v1877_v30 }
 0x2ba   :  { %2304 = vmatpush.bf16.msra.mxu3 %v3175_v62  ;;  %2298 = vmatpush.bf16.msrb.mxu2 %v3160_v24 }
 0x2bb   :  { %3199 = vrot.lane.b32.xlu1 %v3198_v41, %s3208_s18 }
 0x2be   :  { %2305 = vmatpush.bf16.msra.mxu3 %v3174_v39 }
 0x2c1   :  { %3194 = vrot.lane.b32.xlu0 %v3193_v48, %s3208_s18 }
 0x2c2   :  { %2306 = vmatpush.bf16.msra.mxu3 %v3173_v10 }
 0x2c3   :  { %1843 = vrot.lane.b32.xlu1 %v1840_v29, %s3208_s18 }
 0x2c6   :  { %2307 = vmatpush.bf16.msra.mxu3 %v3172_v21 }
 0x2ca   :  { %2308 = vmatpush.bf16.msra.mxu3 %v3171_v4 }
 0x2ce   :  { %2309 = vmatpush.bf16.msra.mxu3 %v3170_v53 }
 0x2d2   :  { %2310 = vmatpush.bf16.msra.mxu3 %v3169_v55  ;;  %v3182_v55 = vld [vmem:[%s4339_s7 + $0x30] sm:$0xff] }
 0x2d6   :  { %2311 = vmatpush.bf16.msra.mxu3 %v3168_v47 }
 0x313   :  { %v1807_v19 = vpop.permute.xlu2 %1806 }
 0x314   :  { %v1817_v25 = vrot.slane %v1807_v19, 6  ;;  %v1818_v0 = vrot.slane %v1807_v19, 7 }
 0x316   :  { %v4141_v12 = vmax.f32 %v4025_v26, %v1817_v25  ;;  %v4145_v35 = vmax.f32 %v4036_v52, %v1818_v0 }
 0x318   :  { %v1950_v41 = vrot.slane %v4141_v12, 4 }
 0x32b   :  { %v4128_v51 = vpop.permute.xlu0 %1771 }
 0x32c   :  { %v1775_v57 = vrot.slane %v4128_v51, 1  ;;  %v1776_v44 = vrot.slane %v4128_v51, 2  ;;  %v1777_v1 = vrot.slane %v4128_v51, 3  ;;  %v1778_v58 = vrot.slane %v4128_v51, 4 }
 0x32d   :  { %v3200_v59 = vpop.permute.xlu1 %3199  ;;  %v1779_v61 = vrot.slane %v4128_v51, 5  ;;  %v1780_v9 = vrot.slane %v4128_v51, 6  ;;  %v1790_v50 = vmax.f32 %v4027_v56, %v4128_v51  ;;  %v1781_v38 = vrot.slane %v4128_v51, 7 }
 0x32e   :  { %v1791_v28 = vmax.f32 %v4010_v23, %v1775_v57  ;;  %v4149_v13 = vunpack.i.h.bf16 %v3200_v59  ;;  %v4155_v27 = vmax.f32 %v4012_v16, %v1776_v44  ;;  %v4158_v40 = vmax.f32 %v4014_v7, %v1777_v1  ;;  %v3183_v1 = vld [vmem:[%s4339_s7 + $0x38] sm:$0xff] }
 0x32f   :  { %v4161_v54 = vmax.f32 %v4016_v36, %v1778_v58  ;;  %v4163_v15 = vunpack.i.l.bf16 %v3200_v59  ;;  %v4180_v29 = vmax.f32 %v4022_v20, %v1779_v61  ;;  %v4191_v42 = vmax.f32 %v4025_v26, %v1780_v9  ;;  %2387 = vmatpush.bf16.msra.mxu0 %v3183_v1 }
 0x330   :  { %v1917_v60 = vrot.slane %v1791_v28, 7  ;;  %v1812_v45 = vrot.slane %v4149_v13, 1  ;;  %v1814_v8 = vrot.slane %v4149_v13, 3  ;;  %v1815_v30 = vrot.slane %v4149_v13, 4 }
 0x331   :  { %v1813_v2 = vrot.slane %v4149_v13, 2  ;;  %v1827_v6 = vmax.f32 %v4027_v56, %v4149_v13  ;;  %v1919_v11 = vrot.slane %v4155_v27, 6  ;;  %v1887_v14 = vrot.slane %v4163_v15, 2 }
 0x332   :  { %v1828_v17 = vmax.f32 %v4010_v23, %v1812_v45  ;;  %v4176_v48 = vmax.f32 %v4014_v7, %v1814_v8  ;;  %v4187_v43 = vmax.f32 %v4016_v36, %v1815_v30  ;;  %v1918_v3 = vsel %vm1751_vm3, %v1917_v60, %v1790_v50 }
 0x333   :  { %v3195_v18 = vpop.permute.xlu0 %3194  ;;  %v1921_v46 = vrot.slane %v4158_v40, 5  ;;  %v1923_v63 = vrot.slane %v4161_v54, 4  ;;  %v1889_v33 = vrot.slane %v4163_v15, 4  ;;  %v1816_v5 = vrot.slane %v4149_v13, 5  ;;  %2388 = vmatpush.bf16.msra.mxu0 %v3182_v55 }
 0x334   :  { %v4199_v62 = vmax.f32 %v4012_v16, %v1813_v2  ;;  %v1940_v37 = vrot.slane %v1827_v6, 2  ;;  %v3197_v39 = vunpack.i.h.bf16 %v3195_v18  ;;  %v1941_v32 = vrot.slane %v1828_v17, 1 }
 0x335   :  { %v1944_v34 = vrot.slane %v4176_v48, 7  ;;  %v1890_v10 = vrot.slane %v4163_v15, 5  ;;  %v3196_v49 = vunpack.i.l.bf16 %v3195_v18  ;;  %v1844_v21 = vpop.permute.xlu1 %1843  ;;  %v1946_v22 = vrot.slane %v4187_v43, 6 }
 0x336   :  { %v1888_v19 = vrot.slane %v4163_v15, 3  ;;  %v1903_v31 = vmax.f32 %v4012_v16, %v1887_v14  ;;  %v1886_v4 = vrot.slane %v3197_v39, 1  ;;  %v4207_v25 = vmax.f32 %v4016_v36, %v1889_v33 }
 0x337   :  { %v1901_v0 = vmax.f32 %v4027_v56, %v3197_v39  ;;  %v1849_v57 = vrot.slane %v3196_v49, 1  ;;  %v1850_v44 = vrot.slane %v3196_v49, 2  ;;  %v1851_v53 = vrot.slane %v3196_v49, 3 }
 0x338   :  { %v1902_v58 = vmax.f32 %v4010_v23, %v1886_v4  ;;  %v1864_v24 = vmax.f32 %v4027_v56, %v3196_v49  ;;  %v1853_v59 = vrot.slane %v1844_v21, 5  ;;  %v1852_v9 = vrot.slane %v1844_v21, 4 }
 0x339   :  { %v1865_v28 = vmax.f32 %v4010_v23, %v1849_v57  ;;  %v1866_v61 = vmax.f32 %v4012_v16, %v1850_v44  ;;  %v1854_v13 = vrot.slane %v1844_v21, 6  ;;  %v1986_v40 = vrot.slane %v1901_v0, 6 }
 0x33a   :  { %v1987_v60 = vrot.slane %v1902_v58, 5  ;;  %v1867_v45 = vmax.f32 %v4014_v7, %v1851_v53  ;;  %v1855_v8 = vrot.slane %v1844_v21, 7  ;;  %v1963_v30 = vrot.slane %v1864_v24, 4 }
 0x33b   :  { %v1964_v50 = vrot.slane %v1865_v28, 3  ;;  %v1966_v56 = vrot.slane %v1866_v61, 2  ;;  %v1869_v2 = vmax.f32 %v4022_v20, %v1853_v59  ;;  %v1989_v23 = vrot.slane %v1903_v31, 4 }
 0x33c   :  { %v1988_v16 = vsel %vm1751_vm3, %v1987_v60, %v1986_v40  ;;  %v1870_v6 = vmax.f32 %v4025_v26, %v1854_v13  ;;  %v1871_v17 = vmax.f32 %v4036_v52, %v1855_v8  ;;  %v1942_v18 = vsel %vm1751_vm3, %v1941_v32, %v1940_v37  ;;  %v3180_v8 = vld [vmem:[%s4339_s7 + $0x20] sm:$0xff] }
 0x33d   :  { %v1904_v47 = vmax.f32 %v4014_v7, %v1888_v19  ;;  %v1965_v14 = vsel %vm1751_vm3, %v1964_v50, %v1963_v30  ;;  %v1968_v33 = vrot.slane %v1867_v45, 1  ;;  %v1990_v39 = vsel %vm1754_vm4, %v1989_v23, %v1988_v16  ;;  %v3177_v30 = vld [vmem:[%s4339_s7 + $0x8] sm:$0xff]  ;;  %v3176_v50 = vld [vmem:[%s4339_s7] sm:$0xff] }
 0x33e   :  { %v1868_v49 = vmax.f32 %v4016_v36, %v1852_v9  ;;  %v1967_v21 = vsel %vm1754_vm4, %v1966_v56, %v1965_v14  ;;  %v1797_v31 = vmax.f32 %v4036_v52, %v1781_v38  ;;  %v1971_v0 = vrot.slane %v1869_v2, 7  ;;  %v3191_v56 = vld [vmem:[%s4342_s9 + $0x38] sm:$0xff]  ;;  %v3190_v2 = vld [vmem:[%s4342_s9 + $0x30] sm:$0xff]  ;;  %v3189_v16 = vld [vmem:[%s4342_s9 + $0x28] sm:$0xff] }
 0x33f   :  { %v1969_v4 = vsel %vm1757_vm5, %v1968_v33, %v1967_v21  ;;  %v1973_v37 = vrot.slane %v1870_v6, 6  ;;  %v1920_v7 = vsel %vm1754_vm4, %v1919_v11, %v1918_v3  ;;  %v1975_v19 = vrot.slane %v1871_v17, 5  ;;  %2470 = vmatpush.bf16.msra.mxu2 %v3191_v56  ;;  %v3187_v33 = vld [vmem:[%s4342_s9 + $0x18] sm:$0xff] }
 0x340   :  { %v1970_v32 = vsel %vm1760_vm6, %v1868_v49, %v1969_v4  ;;  %v1922_v57 = vsel %vm1757_vm5, %v1921_v46, %v1920_v7  ;;  %v1925_v36 = vrot.slane %v4180_v29, 3  ;;  %v1927_v38 = vrot.slane %v4191_v42, 2 }
 0x341   :  { %v1972_v44 = vsel %vm1763_vm7, %v1971_v0, %v1970_v32  ;;  %v1924_v51 = vsel %vm1760_vm6, %v1923_v63, %v1922_v57  ;;  %v1832_v1 = vmax.f32 %v4022_v20, %v1816_v5  ;;  %v1929_v3 = vrot.slane %v1797_v31, 1  ;;  %v3186_v31 = vld [vmem:[%s4342_s9 + $0x10] sm:$0xff] }
 0x342   :  { %v1974_v27 = vsel %vm1766_vm8, %v1973_v37, %v1972_v44  ;;  %v1926_v11 = vsel %vm1763_vm7, %v1925_v36, %v1924_v51  ;;  %v1943_v46 = vsel %vm1754_vm4, %v4199_v62, %v1942_v18  ;;  %v1991_v42 = vrot.slane %v1904_v47, 3  ;;  %v3188_v18 = vld [vmem:[%s4342_s9 + $0x20] sm:$0xff]  ;;  %v3185_v36 = vld [vmem:[%s4342_s9 + $0x8] sm:$0xff] }
 0x343   :  { %v1976_v29 = vsel %vm1769_vm9, %v1975_v19, %v1974_v27  ;;  %v1928_v58 = vsel %vm1766_vm8, %v1927_v38, %v1926_v11  ;;  %v1945_v54 = vsel %vm1757_vm5, %v1944_v34, %v1943_v46  ;;  %v1948_v63 = vrot.slane %v1832_v1, 5  ;;  %2471 = vmatpush.bf16.msra.mxu2 %v3190_v2  ;;  %v3205_v47 = vld [vmem:[%s4340_s6] ss:$0 sm:$0xff] }
 0x344   :  { %v2003_v53 = vpack.c.bf16 %v1976_v29, %v1976_v29  ;;  %v1930_v5 = vsel %vm1769_vm9, %v1929_v3, %v1928_v58  ;;  %v1947_v24 = vsel %vm1760_vm6, %v1946_v22, %v1945_v54  ;;  %v1952_v59 = vrot.slane %v4145_v35, 3  ;;  %v3184_v44 = vld [vmem:[%s4342_s9] sm:$0xff] }
 0x345   :  { %v2001_v62 = vpack.c.bf16 %v1930_v5, %v1930_v5  ;;  %v1949_v28 = vsel %vm1763_vm7, %v1948_v63, %v1947_v24  ;;  %v1906_v48 = vmax.f32 %v4022_v20, %v1890_v10  ;;  %v1992_v34 = vsel %vm1757_vm5, %v1991_v42, %v1990_v39  ;;  %v3206_v51 = vld [vmem:[%s4341_s8] ss:$0 sm:$0xff] }
 0x346   :  { %v1951_v61 = vsel %vm1766_vm8, %v1950_v41, %v1949_v28  ;;  %2299 = vmatmul.bf16.vlgmr.msrb.gmra.mxu2 %v2003_v53  ;;  %v1993_v43 = vrot.slane %v4207_v25, 2  ;;  %v1892_v9 = vrot.slane %v4163_v15, 7  ;;  %v1891_v13 = vrot.slane %v4163_v15, 6  ;;  %v3181_v15 = vld [vmem:[%s4339_s7 + $0x28] sm:$0xff]  ;;  %v3207_v46 = vld [vmem:[%s4343_s10] ss:$0 sm:$0xff] }
 0x347   :  { %2273 = vmatmul.bf16.vlgmr.msrb.gmra.mxu3 %v2001_v62  ;;  %v1953_v22 = vsel %vm1769_vm9, %v1952_v59, %v1951_v61  ;;  %v1995_v20 = vrot.slane %v1906_v48, 1  ;;  %2389 = vmatpush.bf16.msra.mxu0 %v3181_v15 }
 0x348   :  { %v2002_v35 = vpack.c.bf16 %v1953_v22, %v1953_v22  ;;  %v1994_v55 = vsel %vm1760_vm6, %v1993_v43, %v1992_v34  ;;  %v1908_v12 = vmax.f32 %v4036_v52, %v1892_v9  ;;  %v1907_v41 = vmax.f32 %v4025_v26, %v1891_v13  ;;  %v3179_v26 = vld [vmem:[%s4339_s7 + $0x18] sm:$0xff]  ;;  %v3178_v52 = vld [vmem:[%s4339_s7 + $0x10] sm:$0xff]  ;;  %2472 = vmatpush.bf16.msra.mxu2 %v3189_v16 }
 0x349   :  { %v1996_v10 = vsel %vm1763_vm7, %v1995_v20, %v1994_v55 }
 0x34a   :  { %2286 = vmatmul.bf16.vlgmr.msrb.gmra.mxu0 %v2002_v35  ;;  %v1997_v25 = vsel %vm1766_vm8, %v1907_v41, %v1996_v10  ;;  %v1998_v40 = vrot.slane %v1908_v12, 7 }
 0x34b   :  { %2390 = vmatpush.bf16.msra.mxu0 %v3180_v8 }
 0x34c   :  { %v1999_v60 = vsel %vm1769_vm9, %v1998_v40, %v1997_v25  ;;  %2473 = vmatpush.bf16.msra.mxu2 %v3188_v18 }
 0x34d   :  { %v2004_v45 = vpack.c.bf16 %v1999_v60, %v1999_v60 }
 0x34f   :  { %2391 = vmatpush.bf16.msra.mxu0 %v3179_v26 }
 0x350   :  { %2474 = vmatpush.bf16.msra.mxu2 %v3187_v33 }
 0x353   :  { %2392 = vmatpush.bf16.msra.mxu0 %v3178_v52 }
 0x354   :  { %2475 = vmatpush.bf16.msra.mxu2 %v3186_v31 }
 0x357   :  { %2312 = vmatmul.bf16.vlgmr.msra.gmra.mxu3 %v2004_v45  ;;  %2393 = vmatpush.bf16.msra.mxu0 %v3177_v30 }
 0x358   :  { %2476 = vmatpush.bf16.msra.mxu2 %v3185_v36 }
 0x35b   :  { %2394 = vmatpush.bf16.msra.mxu0 %v3176_v50 }
 0x35c   :  { %2477 = vmatpush.bf16.msra.mxu2 %v3184_v44 }
 0x3c7   :  { %v2287_v23 = vpop.f32.mrf.mxu0 }
 0x3c9   :  { %v2300_v6 = vpop.f32.mrf.mxu2 }
 0x3ca   :  { %v2274_v17 = vpop.f32.mrf.mxu3 }
 0x3cb   :  { %v2275_v21 = vadd.f32 %v3205_v47, %v2274_v17 }
 0x3cd   :  { %v2288_v4 = vadd.f32 %v2287_v23, %v2275_v21 }
 0x3cf   :  { %v2289_v14 = vpop.f32.mrf.mxu0  ;;  %v2301_v0 = vadd.f32 %v2300_v6, %v2288_v4 }
 0x3d1   :  { %v2302_v39 = vpop.f32.mrf.mxu2 }
 0x3d2   :  { %v2276_v49 = vpop.f32.mrf.mxu3 }
 0x3da   :  { %v2313_v37 = vpop.f32.mrf.mxu3 }
 0x3db   :  { %v2314_v7 = vadd.f32 %v2313_v37, %v2301_v0 }
 0x3dd   :  { %v2317_v32 = vmax.f32 %v2314_v7, 0.0 }
 0x3df   :  { %v2318_v19 = vpack.c.bf16 %v2317_v32, %v2317_v32 }
 0x3e1   :  { %2395 = vmatmul.bf16.vlgmr.msra.gmra.mxu0 %v2318_v19 }
 0x3e2   :  { %v2315_v57 = vpop.f32.mrf.mxu3 }
 0x45e   :  { %v2396_v38 = vpop.f32.mrf.mxu0 }
 0x45f   :  { %v2397_v1 = vadd.f32 %v3206_v51, %v2396_v38 }
 0x461   :  { %v2400_v27 = vmax.f32 %v2397_v1, 0.0 }
 0x463   :  { %v2401_v11 = vpack.c.bf16 %v2400_v27, %v2400_v27 }
 0x465   :  { %2478 = vmatmul.bf16.vlgmr.msra.gmra.mxu2 %v2401_v11 }
 0x466   :  { %v2398_v3 = vpop.f32.mrf.mxu0 }
 0x4e8   :  { %v2479_v29 = vpop.f32.mrf.mxu2 }
 0x4e9   :  { %v2480_v58 = vadd.f32 %v3207_v46, %v2479_v29 }
 0x4eb   :  { %2483 = vst [vmem:[%s4344_s11] sm:$0xff] %v2480_v58 }
 0x4f0   :  { %v2481_v54 = vpop.f32.mrf.mxu2 }

</bundles_post_ra>
